<compile_context>
chip_gen: v7x
topology: tpu7x:2x2x1
jax: 0.10.0
libtpu: 0.0.40
codegen_flags: <defaults>
</compile_context>

<pallas_src>
import functools

import jax
import jax.numpy as jnp
from jax.experimental import pallas as pl
from jax.experimental.pallas import tpu as pltpu

BN_EPS = 1e-5
_INV_SQRT2 = 0.7071067811865476


def _gelu_exact(x):
    # nn.GELU default = exact erf formulation (matches PyTorch numerics).
    return 0.5 * x * (1.0 + jax.lax.erf(x * _INV_SQRT2))


def _dwconv3x3_folded(x, w9, b, m_top, m_bot, C):
    """Depthwise 3x3 conv on one (H, W*C) plane (W folded into the lane axis).

    x     : (H, W*C) f32
    w9    : (9, W*C) f32 per-lane taps, row k = ky*3+kx; lanes whose tap reads
            across the left/right image border are pre-zeroed in the wrapper.
    b     : (1, W*C) f32 per-lane bias
    m_top : (H, W*C) 0/1 mask, zero in row 0     (kills the h-1 wrap)
    m_bot : (H, W*C) 0/1 mask, zero in row H-1   (kills the h+1 wrap)
    """
    H, WC = x.shape
    srcs = (
        pltpu.roll(x, shift=1, axis=0) * m_top,       # reads h-1
        x,                                            # reads h
        pltpu.roll(x, shift=H - 1, axis=0) * m_bot,   # reads h+1
    )
    acc = jnp.zeros_like(x)
    for ky in range(3):
        s = srcs[ky]
        # W shifts = lane rolls by +/-C; the circular wrap never contributes
        # because the matching edge lanes of w9 are zero.
        taps = (
            pltpu.roll(s, shift=C, axis=1),       # reads w-1
            s,                                    # reads w
            pltpu.roll(s, shift=WC - C, axis=1),  # reads w+1
        )
        for kx in range(3):
            k = ky * 3 + kx
            acc = acc + taps[kx] * w9[k:k + 1, :]
    return acc + b


def _lpi_fused_kernel(x_ref, w1_ref, b1_ref, w2_ref, b2_ref, gm_ref, bt_ref,
                      out_ref, y_scr, stat_scr, *, C, W, Bt, inv_count):
    phase = pl.program_id(0)          # 0: conv1+GELU+stats, 1: BN+conv2
    bb = pl.program_id(1)             # batch-block index
    nb = pl.num_programs(1)
    _, H, WC = x_ref.shape

    # 0/1 masks for the out-of-image rows of the h+-1 taps; computed once per
    # grid step and reused by all Bt planes and both convs.
    row = jax.lax.broadcasted_iota(jnp.int32, (H, WC), 0)
    m_top = jnp.where(row >= 1, 1.0, 0.0).astype(jnp.float32)
    m_bot = jnp.where(row <= H - 2, 1.0, 0.0).astype(jnp.float32)

    # ---------------- phase 0: conv1 + GELU + BN partial sums ----------------
    @pl.when(phase == 0)
    def _phase0():
        w9 = w1_ref[...].astype(jnp.float32)
        b1 = b1_ref[...].astype(jnp.float32)
        ssum = jnp.zeros((1, WC), jnp.float32)
        ssq = jnp.zeros((1, WC), jnp.float32)
        for i in range(Bt):                      # static unroll over the block
            x = x_ref[i].astype(jnp.float32)
            y = _gelu_exact(_dwconv3x3_folded(x, w9, b1, m_top, m_bot, C))
            y_scr[bb * Bt + i] = y               # persistent VMEM, no HBM trip
            ssum = ssum + jnp.sum(y, axis=0, keepdims=True)
            ssq = ssq + jnp.sum(y * y, axis=0, keepdims=True)

        @pl.when(bb == 0)
        def _init_stats():
            stat_scr[...] = jnp.zeros_like(stat_scr)

        stat_scr[0:1, :] = stat_scr[0:1, :] + ssum
        stat_scr[1:2, :] = stat_scr[1:2, :] + ssq

    # -------- BN finalize: once, at the end of the last phase-0 step ---------
    @pl.when((phase == 0) & (bb == nb - 1))
    def _finalize():
        sums = stat_scr[...]                     # (2, WC): [sum(y); sum(y^2)]
        # Per-channel stats need the sum over the W groups folded into the
        # lane axis: cyclic lane-roll reduction by multiples of C.
        if (W & (W - 1)) == 0:                   # power-of-two W: doubling
            total = sums
            sh = C
            while sh < W * C:
                total = total + pltpu.roll(total, shift=sh, axis=1)
                sh *= 2
        else:                                    # general W: add all rotations
            total = sums
            for k in range(1, W):
                total = total + pltpu.roll(sums, shift=k * C, axis=1)
        mean = total[0:1, :] * inv_count
        var = total[1:2, :] * inv_count - mean * mean   # biased (training BN)
        scale = gm_ref[...].astype(jnp.float32) * jax.lax.rsqrt(var + BN_EPS)
        shift = bt_ref[...].astype(jnp.float32) - mean * scale
        stat_scr[0:1, :] = scale                 # reuse scratch for scale/shift
        stat_scr[1:2, :] = shift

    # ---------------- phase 1: normalize + conv2 -> output -------------------
    @pl.when(phase == 1)
    def _phase1():
        w9 = w2_ref[...].astype(jnp.float32)
        b2 = b2_ref[...].astype(jnp.float32)
        scale = stat_scr[0:1, :]
        shift = stat_scr[1:2, :]
        for i in range(Bt):                      # static unroll over the block
            y = y_scr[bb * Bt + i]
            yn = y * scale + shift
            z = _dwconv3x3_folded(yn, w9, b2, m_top, m_bot, C)
            out_ref[i] = z.astype(out_ref.dtype)


def _fold_dw_weights(w_oihw, W):
    """(C,1,3,3) depthwise weights -> (9, W*C) per-lane taps (row k = ky*3+kx).

    Lanes whose tap would read across the left/right image border (w-1 at w==0
    for kx==0, w+1 at w==W-1 for kx==2) are zeroed so the kernel's circular
    lane roll never contributes wrapped values.
    """
    C = w_oihw.shape[0]
    taps = jnp.transpose(w_oihw[:, 0].reshape(C, 9), (1, 0)).astype(jnp.float32)  # (9,C)
    lanes = jnp.tile(taps[:, None, :], (1, W, 1))                                  # (9,W,C)
    kx = jnp.arange(9) % 3
    w_idx = jnp.arange(W)
    drop = ((kx[:, None] == 0) & (w_idx[None, :] == 0)) | \
           ((kx[:, None] == 2) & (w_idx[None, :] == W - 1))                        # (9,W)
    lanes = jnp.where(drop[:, :, None], 0.0, lanes)
    return lanes.reshape(9, W * C)


def _tile_lane(v, W):
    """(C,) per-channel vector -> (1, W*C) per-lane row (lane index = w*C + c)."""
    return jnp.tile(v.astype(jnp.float32), W)[None, :]


def _pick_bt(B, plane_bytes, budget_bytes=2 << 20, max_bt=8):
    bt = max(1, min(B, max_bt, budget_bytes // max(plane_bytes, 1)))
    while B % bt:
        bt -= 1
    return int(bt)


@functools.partial(jax.jit, static_argnames=("H", "W"))
def lpi_forward(x, params, H, W):
    """x: (B, N, C) with N == H*W; params are the raw PyTorch-shaped tensors."""
    B, N, C = x.shape
    assert N == H * W
    w1_oihw, b1, gamma, beta, w2_oihw, b2 = params
    WC = W * C

    # (B,N,C) -> (B,H,W*C): identical row-major memory order (free reshape),
    # lane-dense last dim.
    x_f = x.reshape(B, H, WC)

    w1_l = _fold_dw_weights(w1_oihw, W)
    w2_l = _fold_dw_weights(w2_oihw, W)
    b1_l = _tile_lane(b1, W)
    b2_l = _tile_lane(b2, W)
    g_l = _tile_lane(gamma, W)
    bt_l = _tile_lane(beta, W)

    plane_bytes = H * WC * 4
    Bt = _pick_bt(B, plane_bytes)
    nb = B // Bt

    # VMEM budget: persistent y scratch + double-buffered in/out blocks + params.
    # TODO(synk): if B*H*W*C*4 exceeds the VMEM budget (very large feature
    # maps), fall back to a two-pass HBM-streamed variant with a bf16 y.
    y_bytes = B * H * WC * 4
    blk_bytes = Bt * H * WC * 4
    needed = y_bytes + 4 * blk_bytes + 64 * WC * 4 + (2 << 20)
    try:
        vmem_cap = int(pltpu.get_tpu_info().vmem_capacity_bytes)
    except Exception:
        vmem_cap = 64 * 2**20                      # conservative (v7x TC)
    vmem_limit = int(min(int(vmem_cap * 0.75), max(needed, 16 * 2**20)))

    # Phase-major grid: all phase-0 steps (stats) run before any phase-1 step.
    # x is only needed in phase 0; the output only written in phase 1 (constant
    # block index on the unused phase -> no redundant HBM traffic/writebacks).
    plane_in = pl.BlockSpec((Bt, H, WC), lambda p, b: (b * (1 - p), 0, 0))
    plane_out = pl.BlockSpec((Bt, H, WC), lambda p, b: (b * p, 0, 0))
    w_spec = pl.BlockSpec((9, WC), lambda p, b: (0, 0))
    row_spec = pl.BlockSpec((1, WC), lambda p, b: (0, 0))

    # TODO(synk): on v7x the fused kernel runs on one TensorCore (BN stats are a
    # global sync point); splitting the batch across cores would need a
    # CMEM/VMEM_SHARED cross-core stats reduce.
    out = pl.pallas_call(
        functools.partial(_lpi_fused_kernel, C=C, W=W, Bt=Bt,
                          inv_count=1.0 / float(B * H * W)),
        grid=(2, nb),
        in_specs=[plane_in, w_spec, row_spec, w_spec, row_spec, row_spec, row_spec],
        out_specs=plane_out,
        out_shape=jax.ShapeDtypeStruct((B, H, WC), x.dtype),
        scratch_shapes=[pltpu.VMEM((B, H, WC), jnp.float32),   # persistent y
                        pltpu.VMEM((2, WC), jnp.float32)],     # stats/scale+shift
        compiler_params=pltpu.CompilerParams(
            dimension_semantics=("arbitrary", "arbitrary"),
            vmem_limit_bytes=vmem_limit),
    )(x_f, w1_l, b1_l, w2_l, b2_l, g_l, bt_l)

    return out.reshape(B, N, C)


def _reference(x, raw_params, H, W):
    """Pure-JAX reference (NHWC depthwise conv via lax.conv)."""
    B, N, C = x.shape
    w1_oihw, b1, gamma, beta, w2_oihw, b2 = raw_params
    x_nhwc = x.reshape(B, H, W, C)

    def dw(x_nhwc, w_oihw, b):
        w_hwio = jnp.transpose(w_oihw, (2, 3, 1, 0))   # (C,1,3,3) -> (3,3,1,C)
        y = jax.lax.conv_general_dilated(
            x_nhwc, w_hwio, window_strides=(1, 1), padding="SAME",
            dimension_numbers=("NHWC", "HWIO", "NHWC"),
            feature_group_count=C)
        return y + b

    y = dw(x_nhwc, w1_oihw, b1)
    y = _gelu_exact(y)
    mean = jnp.mean(y, axis=(0, 1, 2), keepdims=True)
    var = jnp.mean((y - mean) ** 2, axis=(0, 1, 2), keepdims=True)
    y = (y - mean) * jax.lax.rsqrt(var + BN_EPS)
    y = y * gamma + beta
    y = dw(y, w2_oihw, b2)
    return y.reshape(B, N, C)


if __name__ == "__main__":
    B, C, H, W = 2, 32, 8, 8
    N = H * W

    key = jax.random.PRNGKey(0)
    kx, k1, kb1, kg, kb, k2, kb2 = jax.random.split(key, 7)

    x = jax.random.normal(kx, (B, N, C), jnp.float32)

    # Parameter shapes follow the module's __init__:
    #   conv1.weight (C,1,3,3), conv1.bias (C,), bn.weight (C,), bn.bias (C,),
    #   conv2.weight (C,1,3,3), conv2.bias (C,)
    w1_oihw = jax.random.normal(k1, (C, 1, 3, 3), jnp.float32) * 0.2
    b1 = jax.random.normal(kb1, (C,), jnp.float32) * 0.1
    gamma = 1.0 + 0.1 * jax.random.normal(kg, (C,), jnp.float32)
    beta = 0.1 * jax.random.normal(kb, (C,), jnp.float32)
    w2_oihw = jax.random.normal(k2, (C, 1, 3, 3), jnp.float32) * 0.2
    b2 = jax.random.normal(kb2, (C,), jnp.float32) * 0.1

    params = (w1_oihw, b1, gamma, beta, w2_oihw, b2)

    out = lpi_forward(x, params, H, W)
    out = jax.block_until_ready(out)

    ref = _reference(x, params, H, W)
    assert out.shape == (B, N, C)
    err = float(jnp.max(jnp.abs(out - ref)))
    assert jnp.allclose(out, ref, atol=1e-3, rtol=1e-3), err

    print("KERNEL_OK")
</pallas_src>

<mosaic_0001>
module attributes {stable_mosaic.version = 11 : i64} {
  func.func @_lpi_fused_kernel(%arg0: i32, %arg1: i32, %arg2: memref<2x8x256xf32, #tpu.memory_space<vmem>>, %arg3: memref<9x256xf32, #tpu.memory_space<vmem>>, %arg4: memref<1x256xf32, #tpu.memory_space<vmem>>, %arg5: memref<9x256xf32, #tpu.memory_space<vmem>>, %arg6: memref<1x256xf32, #tpu.memory_space<vmem>>, %arg7: memref<1x256xf32, #tpu.memory_space<vmem>>, %arg8: memref<1x256xf32, #tpu.memory_space<vmem>>, %arg9: memref<2x8x256xf32, #tpu.memory_space<vmem>>, %arg10: memref<2x8x256xf32, #tpu.memory_space<vmem>>, %arg11: memref<2x256xf32, #tpu.memory_space<vmem>>) attributes {dimension_semantics = [#tpu.dimension_semantics<arbitrary>, #tpu.dimension_semantics<arbitrary>], iteration_bounds = array<i64: 2, 1>, scalar_prefetch = 0 : i64, scratch_operands = 2 : i64, tpu.core_type = #tpu.core_type<tc>, window_params = [{transform_indices = @transform_0, window_bounds = array<i64: 2, 8, 256>}, {pipeline_mode = #tpu.pipeline_mode<synchronous>, transform_indices = @transform_1, window_bounds = array<i64: 9, 256>}, {pipeline_mode = #tpu.pipeline_mode<synchronous>, transform_indices = @transform_2, window_bounds = array<i64: 1, 256>}, {pipeline_mode = #tpu.pipeline_mode<synchronous>, transform_indices = @transform_3, window_bounds = array<i64: 9, 256>}, {pipeline_mode = #tpu.pipeline_mode<synchronous>, transform_indices = @transform_4, window_bounds = array<i64: 1, 256>}, {pipeline_mode = #tpu.pipeline_mode<synchronous>, transform_indices = @transform_5, window_bounds = array<i64: 1, 256>}, {pipeline_mode = #tpu.pipeline_mode<synchronous>, transform_indices = @transform_6, window_bounds = array<i64: 1, 256>}, {transform_indices = @transform_7, window_bounds = array<i64: 2, 8, 256>}]} {
    %0 = tpu.iota {dimensions = array<i32: 0>} : vector<8x256xi32>
    %c1_i32 = arith.constant 1 : i32
    %1 = vector.broadcast %c1_i32 : i32 to vector<8x256xi32>
    %2 = arith.cmpi sge, %0, %1 : vector<8x256xi32>
    %cst = arith.constant 1.000000e+00 : f32
    %cst_0 = arith.constant 0.000000e+00 : f32
    %3 = vector.broadcast %cst : f32 to vector<8x256xf32>
    %4 = vector.broadcast %cst_0 : f32 to vector<8x256xf32>
    %5 = arith.select %2, %3, %4 : vector<8x256xi1>, vector<8x256xf32>
    %c6_i32 = arith.constant 6 : i32
    %6 = vector.broadcast %c6_i32 : i32 to vector<8x256xi32>
    %7 = arith.cmpi sle, %0, %6 : vector<8x256xi32>
    %cst_1 = arith.constant 1.000000e+00 : f32
    %cst_2 = arith.constant 0.000000e+00 : f32
    %8 = vector.broadcast %cst_1 : f32 to vector<8x256xf32>
    %9 = vector.broadcast %cst_2 : f32 to vector<8x256xf32>
    %10 = arith.select %7, %8, %9 : vector<8x256xi1>, vector<8x256xf32>
    %c0_i32 = arith.constant 0 : i32
    %11 = arith.cmpi eq, %arg0, %c0_i32 : i32
    %12 = arith.extui %11 : i1 to i32
    %c0_i32_3 = arith.constant 0 : i32
    %13 = arith.cmpi ne, %12, %c0_i32_3 : i32
    scf.if %13 {
      %c0 = arith.constant 0 : index
      %c0_9 = arith.constant 0 : index
      %22 = vector.load %arg3[%c0, %c0_9] : memref<9x256xf32, #tpu.memory_space<vmem>>, vector<9x256xf32>
      %c0_10 = arith.constant 0 : index
      %c0_11 = arith.constant 0 : index
      %23 = vector.load %arg4[%c0_10, %c0_11] : memref<1x256xf32, #tpu.memory_space<vmem>>, vector<1x256xf32>
      %cst_12 = arith.constant 0.000000e+00 : f32
      %24 = vector.broadcast %cst_12 : f32 to vector<1x256xf32>
      %cst_13 = arith.constant 0.000000e+00 : f32
      %25 = vector.broadcast %cst_13 : f32 to vector<1x256xf32>
      %c0_14 = arith.constant 0 : index
      %c0_15 = arith.constant 0 : index
      %c0_16 = arith.constant 0 : index
      %26 = vector.load %arg2[%c0_14, %c0_15, %c0_16] : memref<2x8x256xf32, #tpu.memory_space<vmem>>, vector<1x8x256xf32>
      %27 = vector.shape_cast %26 : vector<1x8x256xf32> to vector<8x256xf32>
      %c1_i32_17 = arith.constant 1 : i32
      %28 = tpu.dynamic_rotate %27 by %c1_i32_17 dim 0 : vector<8x256xf32>, i32 -> vector<8x256xf32>
      %29 = arith.mulf %28, %5 : vector<8x256xf32>
      %c7_i32 = arith.constant 7 : i32
      %30 = tpu.dynamic_rotate %27 by %c7_i32 dim 0 : vector<8x256xf32>, i32 -> vector<8x256xf32>
      %31 = arith.mulf %30, %10 : vector<8x256xf32>
      %cst_18 = arith.constant 0.000000e+00 : f32
      %32 = vector.broadcast %cst_18 : f32 to vector<8x256xf32>
      %c32_i32 = arith.constant 32 : i32
      %33 = tpu.dynamic_rotate %29 by %c32_i32 dim 1 : vector<8x256xf32>, i32 -> vector<8x256xf32>
      %c224_i32 = arith.constant 224 : i32
      %34 = tpu.dynamic_rotate %29 by %c224_i32 dim 1 : vector<8x256xf32>, i32 -> vector<8x256xf32>
      %35 = vector.extract_strided_slice %22 {offsets = [0, 0], sizes = [1, 256], strides = [1, 1]} : vector<9x256xf32> to vector<1x256xf32>
      %36 = vector.broadcast %35 : vector<1x256xf32> to vector<8x256xf32>
      %37 = arith.mulf %33, %36 : vector<8x256xf32>
      %38 = arith.addf %32, %37 : vector<8x256xf32>
      %39 = vector.extract_strided_slice %22 {offsets = [1, 0], sizes = [1, 256], strides = [1, 1]} : vector<9x256xf32> to vector<1x256xf32>
      %40 = vector.broadcast %39 : vector<1x256xf32> to vector<8x256xf32>
      %41 = arith.mulf %29, %40 : vector<8x256xf32>
      %42 = arith.addf %38, %41 : vector<8x256xf32>
      %43 = vector.extract_strided_slice %22 {offsets = [2, 0], sizes = [1, 256], strides = [1, 1]} : vector<9x256xf32> to vector<1x256xf32>
      %44 = vector.broadcast %43 : vector<1x256xf32> to vector<8x256xf32>
      %45 = arith.mulf %34, %44 : vector<8x256xf32>
      %46 = arith.addf %42, %45 : vector<8x256xf32>
      %c32_i32_19 = arith.constant 32 : i32
      %47 = tpu.dynamic_rotate %27 by %c32_i32_19 dim 1 : vector<8x256xf32>, i32 -> vector<8x256xf32>
      %c224_i32_20 = arith.constant 224 : i32
      %48 = tpu.dynamic_rotate %27 by %c224_i32_20 dim 1 : vector<8x256xf32>, i32 -> vector<8x256xf32>
      %49 = vector.extract_strided_slice %22 {offsets = [3, 0], sizes = [1, 256], strides = [1, 1]} : vector<9x256xf32> to vector<1x256xf32>
      %50 = vector.broadcast %49 : vector<1x256xf32> to vector<8x256xf32>
      %51 = arith.mulf %47, %50 : vector<8x256xf32>
      %52 = arith.addf %46, %51 : vector<8x256xf32>
      %53 = vector.extract_strided_slice %22 {offsets = [4, 0], sizes = [1, 256], strides = [1, 1]} : vector<9x256xf32> to vector<1x256xf32>
      %54 = vector.broadcast %53 : vector<1x256xf32> to vector<8x256xf32>
      %55 = arith.mulf %27, %54 : vector<8x256xf32>
      %56 = arith.addf %52, %55 : vector<8x256xf32>
      %57 = vector.extract_strided_slice %22 {offsets = [5, 0], sizes = [1, 256], strides = [1, 1]} : vector<9x256xf32> to vector<1x256xf32>
      %58 = vector.broadcast %57 : vector<1x256xf32> to vector<8x256xf32>
      %59 = arith.mulf %48, %58 : vector<8x256xf32>
      %60 = arith.addf %56, %59 : vector<8x256xf32>
      %c32_i32_21 = arith.constant 32 : i32
      %61 = tpu.dynamic_rotate %31 by %c32_i32_21 dim 1 : vector<8x256xf32>, i32 -> vector<8x256xf32>
      %c224_i32_22 = arith.constant 224 : i32
      %62 = tpu.dynamic_rotate %31 by %c224_i32_22 dim 1 : vector<8x256xf32>, i32 -> vector<8x256xf32>
      %63 = vector.extract_strided_slice %22 {offsets = [6, 0], sizes = [1, 256], strides = [1, 1]} : vector<9x256xf32> to vector<1x256xf32>
      %64 = vector.broadcast %63 : vector<1x256xf32> to vector<8x256xf32>
      %65 = arith.mulf %61, %64 : vector<8x256xf32>
      %66 = arith.addf %60, %65 : vector<8x256xf32>
      %67 = vector.extract_strided_slice %22 {offsets = [7, 0], sizes = [1, 256], strides = [1, 1]} : vector<9x256xf32> to vector<1x256xf32>
      %68 = vector.broadcast %67 : vector<1x256xf32> to vector<8x256xf32>
      %69 = arith.mulf %31, %68 : vector<8x256xf32>
      %70 = arith.addf %66, %69 : vector<8x256xf32>
      %71 = vector.extract_strided_slice %22 {offsets = [8, 0], sizes = [1, 256], strides = [1, 1]} : vector<9x256xf32> to vector<1x256xf32>
      %72 = vector.broadcast %71 : vector<1x256xf32> to vector<8x256xf32>
      %73 = arith.mulf %62, %72 : vector<8x256xf32>
      %74 = arith.addf %70, %73 : vector<8x256xf32>
      %75 = vector.broadcast %23 : vector<1x256xf32> to vector<8x256xf32>
      %76 = arith.addf %74, %75 : vector<8x256xf32>
      %cst_23 = arith.constant 5.000000e-01 : f32
      %77 = vector.broadcast %cst_23 : f32 to vector<8x256xf32>
      %78 = arith.mulf %77, %76 : vector<8x256xf32>
      %cst_24 = arith.constant 0.707106769 : f32
      %79 = vector.broadcast %cst_24 : f32 to vector<8x256xf32>
      %80 = arith.mulf %76, %79 : vector<8x256xf32>
      %81 = math.erf %80 : vector<8x256xf32>
      %cst_25 = arith.constant 1.000000e+00 : f32
      %82 = vector.broadcast %cst_25 : f32 to vector<8x256xf32>
      %83 = arith.addf %82, %81 : vector<8x256xf32>
      %84 = arith.mulf %78, %83 : vector<8x256xf32>
      %c2_i32 = arith.constant 2 : i32
      %85 = arith.muli %arg1, %c2_i32 : i32
      %c0_i32_26 = arith.constant 0 : i32
      %86 = arith.addi %85, %c0_i32_26 : i32
      %87 = arith.index_cast %86 : i32 to index
      %c0_27 = arith.constant 0 : index
      %c0_28 = arith.constant 0 : index
      %88 = vector.load %arg10[%87, %c0_27, %c0_28] : memref<2x8x256xf32, #tpu.memory_space<vmem>>, vector<1x8x256xf32>
      %89 = vector.shape_cast %88 : vector<1x8x256xf32> to vector<8x256xf32>
      %90 = vector.shape_cast %84 : vector<8x256xf32> to vector<1x8x256xf32>
      tpu.vector_store %arg10[%87, %c0_27, %c0_28], %90 {strides = array<i32>} : memref<2x8x256xf32, #tpu.memory_space<vmem>>, vector<1x8x256xf32>,
      %cst_29 = arith.constant dense<0.000000e+00> : vector<256xf32>
      %91 = vector.multi_reduction <add>, %84, %cst_29 [0] : vector<8x256xf32> to vector<256xf32>
      %92 = vector.shape_cast %91 : vector<256xf32> to vector<1x256xf32>
      %93 = arith.addf %24, %92 : vector<1x256xf32>
      %94 = arith.mulf %84, %84 : vector<8x256xf32>
      %cst_30 = arith.constant dense<0.000000e+00> : vector<256xf32>
      %95 = vector.multi_reduction <add>, %94, %cst_30 [0] : vector<8x256xf32> to vector<256xf32>
      %96 = vector.shape_cast %95 : vector<256xf32> to vector<1x256xf32>
      %97 = arith.addf %25, %96 : vector<1x256xf32>
      %c1 = arith.constant 1 : index
      %c0_31 = arith.constant 0 : index
      %c0_32 = arith.constant 0 : index
      %98 = vector.load %arg2[%c1, %c0_31, %c0_32] : memref<2x8x256xf32, #tpu.memory_space<vmem>>, vector<1x8x256xf32>
      %99 = vector.shape_cast %98 : vector<1x8x256xf32> to vector<8x256xf32>
      %c1_i32_33 = arith.constant 1 : i32
      %100 = tpu.dynamic_rotate %99 by %c1_i32_33 dim 0 : vector<8x256xf32>, i32 -> vector<8x256xf32>
      %101 = arith.mulf %100, %5 : vector<8x256xf32>
      %c7_i32_34 = arith.constant 7 : i32
      %102 = tpu.dynamic_rotate %99 by %c7_i32_34 dim 0 : vector<8x256xf32>, i32 -> vector<8x256xf32>
      %103 = arith.mulf %102, %10 : vector<8x256xf32>
      %cst_35 = arith.constant 0.000000e+00 : f32
      %104 = vector.broadcast %cst_35 : f32 to vector<8x256xf32>
      %c32_i32_36 = arith.constant 32 : i32
      %105 = tpu.dynamic_rotate %101 by %c32_i32_36 dim 1 : vector<8x256xf32>, i32 -> vector<8x256xf32>
      %c224_i32_37 = arith.constant 224 : i32
      %106 = tpu.dynamic_rotate %101 by %c224_i32_37 dim 1 : vector<8x256xf32>, i32 -> vector<8x256xf32>
      %107 = vector.extract_strided_slice %22 {offsets = [0, 0], sizes = [1, 256], strides = [1, 1]} : vector<9x256xf32> to vector<1x256xf32>
      %108 = vector.broadcast %107 : vector<1x256xf32> to vector<8x256xf32>
      %109 = arith.mulf %105, %108 : vector<8x256xf32>
      %110 = arith.addf %104, %109 : vector<8x256xf32>
      %111 = vector.extract_strided_slice %22 {offsets = [1, 0], sizes = [1, 256], strides = [1, 1]} : vector<9x256xf32> to vector<1x256xf32>
      %112 = vector.broadcast %111 : vector<1x256xf32> to vector<8x256xf32>
      %113 = arith.mulf %101, %112 : vector<8x256xf32>
      %114 = arith.addf %110, %113 : vector<8x256xf32>
      %115 = vector.extract_strided_slice %22 {offsets = [2, 0], sizes = [1, 256], strides = [1, 1]} : vector<9x256xf32> to vector<1x256xf32>
      %116 = vector.broadcast %115 : vector<1x256xf32> to vector<8x256xf32>
      %117 = arith.mulf %106, %116 : vector<8x256xf32>
      %118 = arith.addf %114, %117 : vector<8x256xf32>
      %c32_i32_38 = arith.constant 32 : i32
      %119 = tpu.dynamic_rotate %99 by %c32_i32_38 dim 1 : vector<8x256xf32>, i32 -> vector<8x256xf32>
      %c224_i32_39 = arith.constant 224 : i32
      %120 = tpu.dynamic_rotate %99 by %c224_i32_39 dim 1 : vector<8x256xf32>, i32 -> vector<8x256xf32>
      %121 = vector.extract_strided_slice %22 {offsets = [3, 0], sizes = [1, 256], strides = [1, 1]} : vector<9x256xf32> to vector<1x256xf32>
      %122 = vector.broadcast %121 : vector<1x256xf32> to vector<8x256xf32>
      %123 = arith.mulf %119, %122 : vector<8x256xf32>
      %124 = arith.addf %118, %123 : vector<8x256xf32>
      %125 = vector.extract_strided_slice %22 {offsets = [4, 0], sizes = [1, 256], strides = [1, 1]} : vector<9x256xf32> to vector<1x256xf32>
      %126 = vector.broadcast %125 : vector<1x256xf32> to vector<8x256xf32>
      %127 = arith.mulf %99, %126 : vector<8x256xf32>
      %128 = arith.addf %124, %127 : vector<8x256xf32>
      %129 = vector.extract_strided_slice %22 {offsets = [5, 0], sizes = [1, 256], strides = [1, 1]} : vector<9x256xf32> to vector<1x256xf32>
      %130 = vector.broadcast %129 : vector<1x256xf32> to vector<8x256xf32>
      %131 = arith.mulf %120, %130 : vector<8x256xf32>
      %132 = arith.addf %128, %131 : vector<8x256xf32>
      %c32_i32_40 = arith.constant 32 : i32
      %133 = tpu.dynamic_rotate %103 by %c32_i32_40 dim 1 : vector<8x256xf32>, i32 -> vector<8x256xf32>
      %c224_i32_41 = arith.constant 224 : i32
      %134 = tpu.dynamic_rotate %103 by %c224_i32_41 dim 1 : vector<8x256xf32>, i32 -> vector<8x256xf32>
      %135 = vector.extract_strided_slice %22 {offsets = [6, 0], sizes = [1, 256], strides = [1, 1]} : vector<9x256xf32> to vector<1x256xf32>
      %136 = vector.broadcast %135 : vector<1x256xf32> to vector<8x256xf32>
      %137 = arith.mulf %133, %136 : vector<8x256xf32>
      %138 = arith.addf %132, %137 : vector<8x256xf32>
      %139 = vector.extract_strided_slice %22 {offsets = [7, 0], sizes = [1, 256], strides = [1, 1]} : vector<9x256xf32> to vector<1x256xf32>
      %140 = vector.broadcast %139 : vector<1x256xf32> to vector<8x256xf32>
      %141 = arith.mulf %103, %140 : vector<8x256xf32>
      %142 = arith.addf %138, %141 : vector<8x256xf32>
      %143 = vector.extract_strided_slice %22 {offsets = [8, 0], sizes = [1, 256], strides = [1, 1]} : vector<9x256xf32> to vector<1x256xf32>
      %144 = vector.broadcast %143 : vector<1x256xf32> to vector<8x256xf32>
      %145 = arith.mulf %134, %144 : vector<8x256xf32>
      %146 = arith.addf %142, %145 : vector<8x256xf32>
      %147 = vector.broadcast %23 : vector<1x256xf32> to vector<8x256xf32>
      %148 = arith.addf %146, %147 : vector<8x256xf32>
      %cst_42 = arith.constant 5.000000e-01 : f32
      %149 = vector.broadcast %cst_42 : f32 to vector<8x256xf32>
      %150 = arith.mulf %149, %148 : vector<8x256xf32>
      %cst_43 = arith.constant 0.707106769 : f32
      %151 = vector.broadcast %cst_43 : f32 to vector<8x256xf32>
      %152 = arith.mulf %148, %151 : vector<8x256xf32>
      %153 = math.erf %152 : vector<8x256xf32>
      %cst_44 = arith.constant 1.000000e+00 : f32
      %154 = vector.broadcast %cst_44 : f32 to vector<8x256xf32>
      %155 = arith.addf %154, %153 : vector<8x256xf32>
      %156 = arith.mulf %150, %155 : vector<8x256xf32>
      %c2_i32_45 = arith.constant 2 : i32
      %157 = arith.muli %arg1, %c2_i32_45 : i32
      %c1_i32_46 = arith.constant 1 : i32
      %158 = arith.addi %157, %c1_i32_46 : i32
      %159 = arith.index_cast %158 : i32 to index
      %c0_47 = arith.constant 0 : index
      %c0_48 = arith.constant 0 : index
      %160 = vector.load %arg10[%159, %c0_47, %c0_48] : memref<2x8x256xf32, #tpu.memory_space<vmem>>, vector<1x8x256xf32>
      %161 = vector.shape_cast %160 : vector<1x8x256xf32> to vector<8x256xf32>
      %162 = vector.shape_cast %156 : vector<8x256xf32> to vector<1x8x256xf32>
      tpu.vector_store %arg10[%159, %c0_47, %c0_48], %162 {strides = array<i32>} : memref<2x8x256xf32, #tpu.memory_space<vmem>>, vector<1x8x256xf32>,
      %cst_49 = arith.constant dense<0.000000e+00> : vector<256xf32>
      %163 = vector.multi_reduction <add>, %156, %cst_49 [0] : vector<8x256xf32> to vector<256xf32>
      %164 = vector.shape_cast %163 : vector<256xf32> to vector<1x256xf32>
      %165 = arith.addf %93, %164 : vector<1x256xf32>
      %166 = arith.mulf %156, %156 : vector<8x256xf32>
      %cst_50 = arith.constant dense<0.000000e+00> : vector<256xf32>
      %167 = vector.multi_reduction <add>, %166, %cst_50 [0] : vector<8x256xf32> to vector<256xf32>
      %168 = vector.shape_cast %167 : vector<256xf32> to vector<1x256xf32>
      %169 = arith.addf %97, %168 : vector<1x256xf32>
      %c0_i32_51 = arith.constant 0 : i32
      %170 = arith.cmpi eq, %arg1, %c0_i32_51 : i32
      %171 = arith.extui %170 : i1 to i32
      %c0_i32_52 = arith.constant 0 : i32
      %172 = arith.cmpi ne, %171, %c0_i32_52 : i32
      scf.if %172 {
        %cst_61 = arith.constant 0.000000e+00 : f32
        %179 = vector.broadcast %cst_61 : f32 to vector<2x256xf32>
        %c0_62 = arith.constant 0 : index
        %c0_63 = arith.constant 0 : index
        %180 = vector.load %arg11[%c0_62, %c0_63] : memref<2x256xf32, #tpu.memory_space<vmem>>, vector<2x256xf32>
        tpu.vector_store %arg11[%c0_62, %c0_63], %179 {strides = array<i32>} : memref<2x256xf32, #tpu.memory_space<vmem>>, vector<2x256xf32>,
      } else {
      }
      %c0_53 = arith.constant 0 : index
      %c0_54 = arith.constant 0 : index
      %173 = vector.load %arg11[%c0_53, %c0_54] : memref<2x256xf32, #tpu.memory_space<vmem>>, vector<1x256xf32>
      %174 = arith.addf %173, %165 : vector<1x256xf32>
      %c0_55 = arith.constant 0 : index
      %c0_56 = arith.constant 0 : index
      %175 = vector.load %arg11[%c0_55, %c0_56] : memref<2x256xf32, #tpu.memory_space<vmem>>, vector<1x256xf32>
      tpu.vector_store %arg11[%c0_55, %c0_56], %174 {strides = array<i32>} : memref<2x256xf32, #tpu.memory_space<vmem>>, vector<1x256xf32>,
      %c1_57 = arith.constant 1 : index
      %c0_58 = arith.constant 0 : index
      %176 = vector.load %arg11[%c1_57, %c0_58] : memref<2x256xf32, #tpu.memory_space<vmem>>, vector<1x256xf32>
      %177 = arith.addf %176, %169 : vector<1x256xf32>
      %c1_59 = arith.constant 1 : index
      %c0_60 = arith.constant 0 : index
      %178 = vector.load %arg11[%c1_59, %c0_60] : memref<2x256xf32, #tpu.memory_space<vmem>>, vector<1x256xf32>
      tpu.vector_store %arg11[%c1_59, %c0_60], %177 {strides = array<i32>} : memref<2x256xf32, #tpu.memory_space<vmem>>, vector<1x256xf32>,
    } else {
    }
    %c0_i32_4 = arith.constant 0 : i32
    %14 = arith.cmpi eq, %arg0, %c0_i32_4 : i32
    %c0_i32_5 = arith.constant 0 : i32
    %15 = arith.cmpi eq, %arg1, %c0_i32_5 : i32
    %16 = arith.andi %14, %15 : i1
    %17 = arith.extui %16 : i1 to i32
    %c0_i32_6 = arith.constant 0 : i32
    %18 = arith.cmpi ne, %17, %c0_i32_6 : i32
    scf.if %18 {
      %c0 = arith.constant 0 : index
      %c0_9 = arith.constant 0 : index
      %22 = vector.load %arg11[%c0, %c0_9] : memref<2x256xf32, #tpu.memory_space<vmem>>, vector<2x256xf32>
      %c32_i32 = arith.constant 32 : i32
      %23 = tpu.dynamic_rotate %22 by %c32_i32 dim 1 : vector<2x256xf32>, i32 -> vector<2x256xf32>
      %24 = arith.addf %22, %23 : vector<2x256xf32>
      %c64_i32 = arith.constant 64 : i32
      %25 = tpu.dynamic_rotate %24 by %c64_i32 dim 1 : vector<2x256xf32>, i32 -> vector<2x256xf32>
      %26 = arith.addf %24, %25 : vector<2x256xf32>
      %c128_i32 = arith.constant 128 : i32
      %27 = tpu.dynamic_rotate %26 by %c128_i32 dim 1 : vector<2x256xf32>, i32 -> vector<2x256xf32>
      %28 = arith.addf %26, %27 : vector<2x256xf32>
      %29 = vector.extract_strided_slice %28 {offsets = [0, 0], sizes = [1, 256], strides = [1, 1]} : vector<2x256xf32> to vector<1x256xf32>
      %cst_10 = arith.constant 7.812500e-03 : f32
      %30 = vector.broadcast %cst_10 : f32 to vector<1x256xf32>
      %31 = arith.mulf %29, %30 : vector<1x256xf32>
      %32 = vector.extract_strided_slice %28 {offsets = [1, 0], sizes = [1, 256], strides = [1, 1]} : vector<2x256xf32> to vector<1x256xf32>
      %cst_11 = arith.constant 7.812500e-03 : f32
      %33 = vector.broadcast %cst_11 : f32 to vector<1x256xf32>
      %34 = arith.mulf %32, %33 : vector<1x256xf32>
      %35 = arith.mulf %31, %31 : vector<1x256xf32>
      %36 = arith.subf %34, %35 : vector<1x256xf32>
      %c0_12 = arith.constant 0 : index
      %c0_13 = arith.constant 0 : index
      %37 = vector.load %arg7[%c0_12, %c0_13] : memref<1x256xf32, #tpu.memory_space<vmem>>, vector<1x256xf32>
      %cst_14 = arith.constant 9.99999974E-6 : f32
      %38 = vector.broadcast %cst_14 : f32 to vector<1x256xf32>
      %39 = arith.addf %36, %38 : vector<1x256xf32>
      %40 = math.rsqrt %39 : vector<1x256xf32>
      %41 = arith.mulf %37, %40 : vector<1x256xf32>
      %c0_15 = arith.constant 0 : index
      %c0_16 = arith.constant 0 : index
      %42 = vector.load %arg8[%c0_15, %c0_16] : memref<1x256xf32, #tpu.memory_space<vmem>>, vector<1x256xf32>
      %43 = arith.mulf %31, %41 : vector<1x256xf32>
      %44 = arith.subf %42, %43 : vector<1x256xf32>
      %c0_17 = arith.constant 0 : index
      %c0_18 = arith.constant 0 : index
      %45 = vector.load %arg11[%c0_17, %c0_18] : memref<2x256xf32, #tpu.memory_space<vmem>>, vector<1x256xf32>
      tpu.vector_store %arg11[%c0_17, %c0_18], %41 {strides = array<i32>} : memref<2x256xf32, #tpu.memory_space<vmem>>, vector<1x256xf32>,
      %c1 = arith.constant 1 : index
      %c0_19 = arith.constant 0 : index
      %46 = vector.load %arg11[%c1, %c0_19] : memref<2x256xf32, #tpu.memory_space<vmem>>, vector<1x256xf32>
      tpu.vector_store %arg11[%c1, %c0_19], %44 {strides = array<i32>} : memref<2x256xf32, #tpu.memory_space<vmem>>, vector<1x256xf32>,
    } else {
    }
    %c1_i32_7 = arith.constant 1 : i32
    %19 = arith.cmpi eq, %arg0, %c1_i32_7 : i32
    %20 = arith.extui %19 : i1 to i32
    %c0_i32_8 = arith.constant 0 : i32
    %21 = arith.cmpi ne, %20, %c0_i32_8 : i32
    scf.if %21 {
      %c0 = arith.constant 0 : index
      %c0_9 = arith.constant 0 : index
      %22 = vector.load %arg5[%c0, %c0_9] : memref<9x256xf32, #tpu.memory_space<vmem>>, vector<9x256xf32>
      %c0_10 = arith.constant 0 : index
      %c0_11 = arith.constant 0 : index
      %23 = vector.load %arg6[%c0_10, %c0_11] : memref<1x256xf32, #tpu.memory_space<vmem>>, vector<1x256xf32>
      %c0_12 = arith.constant 0 : index
      %c0_13 = arith.constant 0 : index
      %24 = vector.load %arg11[%c0_12, %c0_13] : memref<2x256xf32, #tpu.memory_space<vmem>>, vector<1x256xf32>
      %c1 = arith.constant 1 : index
      %c0_14 = arith.constant 0 : index
      %25 = vector.load %arg11[%c1, %c0_14] : memref<2x256xf32, #tpu.memory_space<vmem>>, vector<1x256xf32>
      %c2_i32 = arith.constant 2 : i32
      %26 = arith.muli %arg1, %c2_i32 : i32
      %c0_i32_15 = arith.constant 0 : i32
      %27 = arith.addi %26, %c0_i32_15 : i32
      %28 = arith.index_cast %27 : i32 to index
      %c0_16 = arith.constant 0 : index
      %c0_17 = arith.constant 0 : index
      %29 = vector.load %arg10[%28, %c0_16, %c0_17] : memref<2x8x256xf32, #tpu.memory_space<vmem>>, vector<1x8x256xf32>
      %30 = vector.shape_cast %29 : vector<1x8x256xf32> to vector<8x256xf32>
      %31 = vector.broadcast %24 : vector<1x256xf32> to vector<8x256xf32>
      %32 = arith.mulf %30, %31 : vector<8x256xf32>
      %33 = vector.broadcast %25 : vector<1x256xf32> to vector<8x256xf32>
      %34 = arith.addf %32, %33 : vector<8x256xf32>
      %c1_i32_18 = arith.constant 1 : i32
      %35 = tpu.dynamic_rotate %34 by %c1_i32_18 dim 0 : vector<8x256xf32>, i32 -> vector<8x256xf32>
      %36 = arith.mulf %35, %5 : vector<8x256xf32>
      %c7_i32 = arith.constant 7 : i32
      %37 = tpu.dynamic_rotate %34 by %c7_i32 dim 0 : vector<8x256xf32>, i32 -> vector<8x256xf32>
      %38 = arith.mulf %37, %10 : vector<8x256xf32>
      %cst_19 = arith.constant 0.000000e+00 : f32
      %39 = vector.broadcast %cst_19 : f32 to vector<8x256xf32>
      %c32_i32 = arith.constant 32 : i32
      %40 = tpu.dynamic_rotate %36 by %c32_i32 dim 1 : vector<8x256xf32>, i32 -> vector<8x256xf32>
      %c224_i32 = arith.constant 224 : i32
      %41 = tpu.dynamic_rotate %36 by %c224_i32 dim 1 : vector<8x256xf32>, i32 -> vector<8x256xf32>
      %42 = vector.extract_strided_slice %22 {offsets = [0, 0], sizes = [1, 256], strides = [1, 1]} : vector<9x256xf32> to vector<1x256xf32>
      %43 = vector.broadcast %42 : vector<1x256xf32> to vector<8x256xf32>
      %44 = arith.mulf %40, %43 : vector<8x256xf32>
      %45 = arith.addf %39, %44 : vector<8x256xf32>
      %46 = vector.extract_strided_slice %22 {offsets = [1, 0], sizes = [1, 256], strides = [1, 1]} : vector<9x256xf32> to vector<1x256xf32>
      %47 = vector.broadcast %46 : vector<1x256xf32> to vector<8x256xf32>
      %48 = arith.mulf %36, %47 : vector<8x256xf32>
      %49 = arith.addf %45, %48 : vector<8x256xf32>
      %50 = vector.extract_strided_slice %22 {offsets = [2, 0], sizes = [1, 256], strides = [1, 1]} : vector<9x256xf32> to vector<1x256xf32>
      %51 = vector.broadcast %50 : vector<1x256xf32> to vector<8x256xf32>
      %52 = arith.mulf %41, %51 : vector<8x256xf32>
      %53 = arith.addf %49, %52 : vector<8x256xf32>
      %c32_i32_20 = arith.constant 32 : i32
      %54 = tpu.dynamic_rotate %34 by %c32_i32_20 dim 1 : vector<8x256xf32>, i32 -> vector<8x256xf32>
      %c224_i32_21 = arith.constant 224 : i32
      %55 = tpu.dynamic_rotate %34 by %c224_i32_21 dim 1 : vector<8x256xf32>, i32 -> vector<8x256xf32>
      %56 = vector.extract_strided_slice %22 {offsets = [3, 0], sizes = [1, 256], strides = [1, 1]} : vector<9x256xf32> to vector<1x256xf32>
      %57 = vector.broadcast %56 : vector<1x256xf32> to vector<8x256xf32>
      %58 = arith.mulf %54, %57 : vector<8x256xf32>
      %59 = arith.addf %53, %58 : vector<8x256xf32>
      %60 = vector.extract_strided_slice %22 {offsets = [4, 0], sizes = [1, 256], strides = [1, 1]} : vector<9x256xf32> to vector<1x256xf32>
      %61 = vector.broadcast %60 : vector<1x256xf32> to vector<8x256xf32>
      %62 = arith.mulf %34, %61 : vector<8x256xf32>
      %63 = arith.addf %59, %62 : vector<8x256xf32>
      %64 = vector.extract_strided_slice %22 {offsets = [5, 0], sizes = [1, 256], strides = [1, 1]} : vector<9x256xf32> to vector<1x256xf32>
      %65 = vector.broadcast %64 : vector<1x256xf32> to vector<8x256xf32>
      %66 = arith.mulf %55, %65 : vector<8x256xf32>
      %67 = arith.addf %63, %66 : vector<8x256xf32>
      %c32_i32_22 = arith.constant 32 : i32
      %68 = tpu.dynamic_rotate %38 by %c32_i32_22 dim 1 : vector<8x256xf32>, i32 -> vector<8x256xf32>
      %c224_i32_23 = arith.constant 224 : i32
      %69 = tpu.dynamic_rotate %38 by %c224_i32_23 dim 1 : vector<8x256xf32>, i32 -> vector<8x256xf32>
      %70 = vector.extract_strided_slice %22 {offsets = [6, 0], sizes = [1, 256], strides = [1, 1]} : vector<9x256xf32> to vector<1x256xf32>
      %71 = vector.broadcast %70 : vector<1x256xf32> to vector<8x256xf32>
      %72 = arith.mulf %68, %71 : vector<8x256xf32>
      %73 = arith.addf %67, %72 : vector<8x256xf32>
      %74 = vector.extract_strided_slice %22 {offsets = [7, 0], sizes = [1, 256], strides = [1, 1]} : vector<9x256xf32> to vector<1x256xf32>
      %75 = vector.broadcast %74 : vector<1x256xf32> to vector<8x256xf32>
      %76 = arith.mulf %38, %75 : vector<8x256xf32>
      %77 = arith.addf %73, %76 : vector<8x256xf32>
      %78 = vector.extract_strided_slice %22 {offsets = [8, 0], sizes = [1, 256], strides = [1, 1]} : vector<9x256xf32> to vector<1x256xf32>
      %79 = vector.broadcast %78 : vector<1x256xf32> to vector<8x256xf32>
      %80 = arith.mulf %69, %79 : vector<8x256xf32>
      %81 = arith.addf %77, %80 : vector<8x256xf32>
      %82 = vector.broadcast %23 : vector<1x256xf32> to vector<8x256xf32>
      %83 = arith.addf %81, %82 : vector<8x256xf32>
      %c0_24 = arith.constant 0 : index
      %c0_25 = arith.constant 0 : index
      %c0_26 = arith.constant 0 : index
      %84 = vector.load %arg9[%c0_24, %c0_25, %c0_26] : memref<2x8x256xf32, #tpu.memory_space<vmem>>, vector<1x8x256xf32>
      %85 = vector.shape_cast %84 : vector<1x8x256xf32> to vector<8x256xf32>
      %86 = vector.shape_cast %83 : vector<8x256xf32> to vector<1x8x256xf32>
      tpu.vector_store %arg9[%c0_24, %c0_25, %c0_26], %86 {strides = array<i32>} : memref<2x8x256xf32, #tpu.memory_space<vmem>>, vector<1x8x256xf32>,
      %c2_i32_27 = arith.constant 2 : i32
      %87 = arith.muli %arg1, %c2_i32_27 : i32
      %c1_i32_28 = arith.constant 1 : i32
      %88 = arith.addi %87, %c1_i32_28 : i32
      %89 = arith.index_cast %88 : i32 to index
      %c0_29 = arith.constant 0 : index
      %c0_30 = arith.constant 0 : index
      %90 = vector.load %arg10[%89, %c0_29, %c0_30] : memref<2x8x256xf32, #tpu.memory_space<vmem>>, vector<1x8x256xf32>
      %91 = vector.shape_cast %90 : vector<1x8x256xf32> to vector<8x256xf32>
      %92 = vector.broadcast %24 : vector<1x256xf32> to vector<8x256xf32>
      %93 = arith.mulf %91, %92 : vector<8x256xf32>
      %94 = vector.broadcast %25 : vector<1x256xf32> to vector<8x256xf32>
      %95 = arith.addf %93, %94 : vector<8x256xf32>
      %c1_i32_31 = arith.constant 1 : i32
      %96 = tpu.dynamic_rotate %95 by %c1_i32_31 dim 0 : vector<8x256xf32>, i32 -> vector<8x256xf32>
      %97 = arith.mulf %96, %5 : vector<8x256xf32>
      %c7_i32_32 = arith.constant 7 : i32
      %98 = tpu.dynamic_rotate %95 by %c7_i32_32 dim 0 : vector<8x256xf32>, i32 -> vector<8x256xf32>
      %99 = arith.mulf %98, %10 : vector<8x256xf32>
      %cst_33 = arith.constant 0.000000e+00 : f32
      %100 = vector.broadcast %cst_33 : f32 to vector<8x256xf32>
      %c32_i32_34 = arith.constant 32 : i32
      %101 = tpu.dynamic_rotate %97 by %c32_i32_34 dim 1 : vector<8x256xf32>, i32 -> vector<8x256xf32>
      %c224_i32_35 = arith.constant 224 : i32
      %102 = tpu.dynamic_rotate %97 by %c224_i32_35 dim 1 : vector<8x256xf32>, i32 -> vector<8x256xf32>
      %103 = vector.extract_strided_slice %22 {offsets = [0, 0], sizes = [1, 256], strides = [1, 1]} : vector<9x256xf32> to vector<1x256xf32>
      %104 = vector.broadcast %103 : vector<1x256xf32> to vector<8x256xf32>
      %105 = arith.mulf %101, %104 : vector<8x256xf32>
      %106 = arith.addf %100, %105 : vector<8x256xf32>
      %107 = vector.extract_strided_slice %22 {offsets = [1, 0], sizes = [1, 256], strides = [1, 1]} : vector<9x256xf32> to vector<1x256xf32>
      %108 = vector.broadcast %107 : vector<1x256xf32> to vector<8x256xf32>
      %109 = arith.mulf %97, %108 : vector<8x256xf32>
      %110 = arith.addf %106, %109 : vector<8x256xf32>
      %111 = vector.extract_strided_slice %22 {offsets = [2, 0], sizes = [1, 256], strides = [1, 1]} : vector<9x256xf32> to vector<1x256xf32>
      %112 = vector.broadcast %111 : vector<1x256xf32> to vector<8x256xf32>
      %113 = arith.mulf %102, %112 : vector<8x256xf32>
      %114 = arith.addf %110, %113 : vector<8x256xf32>
      %c32_i32_36 = arith.constant 32 : i32
      %115 = tpu.dynamic_rotate %95 by %c32_i32_36 dim 1 : vector<8x256xf32>, i32 -> vector<8x256xf32>
      %c224_i32_37 = arith.constant 224 : i32
      %116 = tpu.dynamic_rotate %95 by %c224_i32_37 dim 1 : vector<8x256xf32>, i32 -> vector<8x256xf32>
      %117 = vector.extract_strided_slice %22 {offsets = [3, 0], sizes = [1, 256], strides = [1, 1]} : vector<9x256xf32> to vector<1x256xf32>
      %118 = vector.broadcast %117 : vector<1x256xf32> to vector<8x256xf32>
      %119 = arith.mulf %115, %118 : vector<8x256xf32>
      %120 = arith.addf %114, %119 : vector<8x256xf32>
      %121 = vector.extract_strided_slice %22 {offsets = [4, 0], sizes = [1, 256], strides = [1, 1]} : vector<9x256xf32> to vector<1x256xf32>
      %122 = vector.broadcast %121 : vector<1x256xf32> to vector<8x256xf32>
      %123 = arith.mulf %95, %122 : vector<8x256xf32>
      %124 = arith.addf %120, %123 : vector<8x256xf32>
      %125 = vector.extract_strided_slice %22 {offsets = [5, 0], sizes = [1, 256], strides = [1, 1]} : vector<9x256xf32> to vector<1x256xf32>
      %126 = vector.broadcast %125 : vector<1x256xf32> to vector<8x256xf32>
      %127 = arith.mulf %116, %126 : vector<8x256xf32>
      %128 = arith.addf %124, %127 : vector<8x256xf32>
      %c32_i32_38 = arith.constant 32 : i32
      %129 = tpu.dynamic_rotate %99 by %c32_i32_38 dim 1 : vector<8x256xf32>, i32 -> vector<8x256xf32>
      %c224_i32_39 = arith.constant 224 : i32
      %130 = tpu.dynamic_rotate %99 by %c224_i32_39 dim 1 : vector<8x256xf32>, i32 -> vector<8x256xf32>
      %131 = vector.extract_strided_slice %22 {offsets = [6, 0], sizes = [1, 256], strides = [1, 1]} : vector<9x256xf32> to vector<1x256xf32>
      %132 = vector.broadcast %131 : vector<1x256xf32> to vector<8x256xf32>
      %133 = arith.mulf %129, %132 : vector<8x256xf32>
      %134 = arith.addf %128, %133 : vector<8x256xf32>
      %135 = vector.extract_strided_slice %22 {offsets = [7, 0], sizes = [1, 256], strides = [1, 1]} : vector<9x256xf32> to vector<1x256xf32>
      %136 = vector.broadcast %135 : vector<1x256xf32> to vector<8x256xf32>
      %137 = arith.mulf %99, %136 : vector<8x256xf32>
      %138 = arith.addf %134, %137 : vector<8x256xf32>
      %139 = vector.extract_strided_slice %22 {offsets = [8, 0], sizes = [1, 256], strides = [1, 1]} : vector<9x256xf32> to vector<1x256xf32>
      %140 = vector.broadcast %139 : vector<1x256xf32> to vector<8x256xf32>
      %141 = arith.mulf %130, %140 : vector<8x256xf32>
      %142 = arith.addf %138, %141 : vector<8x256xf32>
      %143 = vector.broadcast %23 : vector<1x256xf32> to vector<8x256xf32>
      %144 = arith.addf %142, %143 : vector<8x256xf32>
      %c1_40 = arith.constant 1 : index
      %c0_41 = arith.constant 0 : index
      %c0_42 = arith.constant 0 : index
      %145 = vector.load %arg9[%c1_40, %c0_41, %c0_42] : memref<2x8x256xf32, #tpu.memory_space<vmem>>, vector<1x8x256xf32>
      %146 = vector.shape_cast %145 : vector<1x8x256xf32> to vector<8x256xf32>
      %147 = vector.shape_cast %144 : vector<8x256xf32> to vector<1x8x256xf32>
      tpu.vector_store %arg9[%c1_40, %c0_41, %c0_42], %147 {strides = array<i32>} : memref<2x8x256xf32, #tpu.memory_space<vmem>>, vector<1x8x256xf32>,
    } else {
    }
    return
  }
  func.func @transform_0(%arg0: i32, %arg1: i32) -> (i32, i32, i32) {
    %c1_i32 = arith.constant 1 : i32
    %0 = arith.subi %c1_i32, %arg0 : i32
    %1 = arith.muli %arg1, %0 : i32
    %c0_i32 = arith.constant 0 : i32
    %c0_i32_0 = arith.constant 0 : i32
    %c0_i32_1 = arith.constant 0 : i32
    return %1, %c0_i32, %c0_i32_0 : i32, i32, i32
  }
  func.func @transform_1(%arg0: i32, %arg1: i32) -> (i32, i32) {
    %c0_i32 = arith.constant 0 : i32
    %c0_i32_0 = arith.constant 0 : i32
    %c0_i32_1 = arith.constant 0 : i32
    return %c0_i32, %c0_i32_0 : i32, i32
  }
  func.func @transform_2(%arg0: i32, %arg1: i32) -> (i32, i32) {
    %c0_i32 = arith.constant 0 : i32
    %c0_i32_0 = arith.constant 0 : i32
    %c0_i32_1 = arith.constant 0 : i32
    return %c0_i32, %c0_i32_0 : i32, i32
  }
  func.func @transform_3(%arg0: i32, %arg1: i32) -> (i32, i32) {
    %c0_i32 = arith.constant 0 : i32
    %c0_i32_0 = arith.constant 0 : i32
    %c0_i32_1 = arith.constant 0 : i32
    return %c0_i32, %c0_i32_0 : i32, i32
  }
  func.func @transform_4(%arg0: i32, %arg1: i32) -> (i32, i32) {
    %c0_i32 = arith.constant 0 : i32
    %c0_i32_0 = arith.constant 0 : i32
    %c0_i32_1 = arith.constant 0 : i32
    return %c0_i32, %c0_i32_0 : i32, i32
  }
  func.func @transform_5(%arg0: i32, %arg1: i32) -> (i32, i32) {
    %c0_i32 = arith.constant 0 : i32
    %c0_i32_0 = arith.constant 0 : i32
    %c0_i32_1 = arith.constant 0 : i32
    return %c0_i32, %c0_i32_0 : i32, i32
  }
  func.func @transform_6(%arg0: i32, %arg1: i32) -> (i32, i32) {
    %c0_i32 = arith.constant 0 : i32
    %c0_i32_0 = arith.constant 0 : i32
    %c0_i32_1 = arith.constant 0 : i32
    return %c0_i32, %c0_i32_0 : i32, i32
  }
  func.func @transform_7(%arg0: i32, %arg1: i32) -> (i32, i32, i32) {
    %0 = arith.muli %arg1, %arg0 : i32
    %c0_i32 = arith.constant 0 : i32
    %c0_i32_0 = arith.constant 0 : i32
    %c0_i32_1 = arith.constant 0 : i32
    return %0, %c0_i32, %c0_i32_0 : i32, i32, i32
  }
}

</mosaic_0001>

<bundles_post_ra>
// kernel: squeeze.3
= control target key start
LH: loop header
LB: loop body
LE: loop exit
PB: predicated region body
PF: predicated region fallthrough
CT: control target
= control target key end

     0   :  { %vm16_vm0 = vcmask 261120   ;;  %s61_s0 = inlined_call_operand.vmem [shape: f32[32,3,3], index: 0, kind: input, shape index: {}]   ;;  %s62_s1 = inlined_call_operand.vmem [shape: f32[32,9], index: 1, kind: output, shape index: {}]  }
   0x1   :  { %v29_v0 = vld [vmem:[%s61_s0 + $0x8] sm:$0xf]  ;;  %v30_v1 = vld [vmem:[%s61_s0 + $0x4] sm:$0xf]  ;;  %v13_v2 = vld [vmem:[%s61_s0] sm:$0xf] }
   0x2   :  { %8 = vst [vmem:[#allocation0 + $0x10] sm:$0xf] %v29_v0  ;;  %12 = vst [vmem:[#allocation0 + $0x8] sm:$0xf] %v30_v1 }
   0x3   :  { %14 = vst [vmem:[#allocation0] sm:$0xf] %v13_v2 }
   0x9   :  { %v19_v4 = vld [vmem:[#allocation0 + $0x8] sm:$0x7]   ;;  %v24_v5 = vld [vmem:[#allocation0 + $0x10] sm:$0x7]  }
   0xa   :  { %v15_v3 = vld [vmem:[#allocation0] sm:$0x7]   ;;  %31 = vst.msk [vmem:[%s62_s1 + $0x3] sm:$0x7] %vm16_vm0, %v19_v4   ;;  %32 = vst.msk [vmem:[%s62_s1 + $0x6] sm:$0x7] %vm16_vm0, %v24_v5  }
   0xb   :  { %17 = vst.msk [vmem:[%s62_s1] sm:$0x7] %vm16_vm0, %v15_v3  }

// kernel: tile.39
= control target key start
LH: loop header
LB: loop body
LE: loop exit
PB: predicated region body
PF: predicated region fallthrough
CT: control target
= control target key end

     0   :  { %s22_s0 = inlined_call_operand.vmem [shape: f32[32], index: 0, kind: input, shape index: {}]   ;;  %s23_s1 = inlined_call_operand.vmem [shape: f32[8,32], index: 1, kind: output, shape index: {}]  }
   0x1   :  { %v4_v0 = vld [vmem:[%s22_s0] ss:$0 sm:$0xff] }
   0x2   :  { %5 = vst [vmem:[%s23_s1] sm:$0xff] %v4_v0 }

// kernel: tile.40
= control target key start
LH: loop header
LB: loop body
LE: loop exit
PB: predicated region body
PF: predicated region fallthrough
CT: control target
= control target key end

     0   :  { %s7_s6 = smov 3  ;;  %s14_s9 = smov 3  ;;  %vm4_vm0 = vcmask 261120   ;;  %vm11_vm1 = vcmask 1048320   ;;  %vm18_vm2 = vcmask 785920   ;;  %vm25_vm3 = vcmask 523520   ;;  %s76_s0 = inlined_call_operand.vmem [shape: f32[8,32], index: 0, kind: input, shape index: {}]   ;;  %s77_s1 = inlined_call_operand.vmem [shape: f32[1,256], index: 1, kind: output, shape index: {}]  }
   0x1   :  { %v38_v0 = vld [vmem:[%s76_s0 + $0x3] ss:$4 sm:%s7_s6]   ;;  %s45_s10 = smov 96   ;;  %s21_s11 = smov 3  ;;  %v39_v1 = vld [vmem:[%s76_s0 + $0x2] ss:$4 sm:%s14_s9]  }
   0x2   :  { %9 = vrot.lane.b32.xlu0 %v38_v0, %s45_s10  ;;  %v40_v2 = vld [vmem:[%s76_s0 + $0x1] ss:$4 sm:%s21_s11]   ;;  %s2_s16 = smov 3  ;;  %s46_s17 = smov 32  }
   0x3   :  { %23 = vrot.lane.b32.xlu1 %v40_v2, %s46_s17  ;;  %v3_v3 = vld [vmem:[%s76_s0] ss:$4 sm:%s2_s16]   ;;  %s47_s0 = smov 64  }
   0x4   :  { %5 = vst.msk [vmem:[#allocation0] ss:$8 sm:$0x3] %vm4_vm0, %v3_v3  }
   0x6   :  { %16 = vrot.lane.b32.xlu0 %v39_v1, %s47_s0 }
  0x74   :  { %v10_v4 = vpop.permute.xlu0 %9  }
  0x75   :  { %12 = vst.msk [vmem:[#allocation0] ss:$8 sm:$0x3] %vm11_vm1, %v10_v4   ;;  %v24_v5 = vpop.permute.xlu1 %23  }
  0x78   :  { %v17_v6 = vpop.permute.xlu0 %16  }
  0x79   :  { %19 = vst.msk [vmem:[#allocation0] ss:$8 sm:$0x3] %vm18_vm2, %v17_v6  }
  0x7a   :  { %26 = vst.msk [vmem:[#allocation0] ss:$8 sm:$0x3] %vm25_vm3, %v24_v5  }
  0x81   :  { %v30_v7 = vld [vmem:[#allocation0] sm:$0x1]  ;;  %v34_v8 = vld [vmem:[#allocation0 + $0x8] sm:$0x1] }
  0x82   :  { %32 = vst [vmem:[%s77_s1] sm:$0x1] %v30_v7  ;;  %41 = vst [vmem:[%s77_s1 + $0x1] sm:$0x1] %v34_v8 }

// kernel: lpi_forward.1
= control target key start
LH: loop header
LB: loop body
LE: loop exit
PB: predicated region body
PF: predicated region fallthrough
CT: control target
= control target key end

     0   :  { %s1408_s24 = smov 0   ;;  %s1410_s25 = smov 0   ;;  %s1850_s0 = inlined_call_operand.vmem [shape: f32[2,8,256], index: 0, kind: input, shape index: {}]   ;;  %s1851_s1 = inlined_call_operand.vmem [shape: f32[9,256], index: 1, kind: input, shape index: {}]   ;;  %s1852_s2 = inlined_call_operand.vmem [shape: f32[1,256], index: 2, kind: input, shape index: {}]   ;;  %s1853_s3 = inlined_call_operand.vmem [shape: f32[9,256], index: 3, kind: input, shape index: {}]   ;;  %s1854_s4 = inlined_call_operand.vmem [shape: f32[1,256], index: 4, kind: input, shape index: {}]   ;;  %s1855_s5 = inlined_call_operand.vmem [shape: f32[1,256], index: 5, kind: input, shape index: {}]   ;;  %s1856_s6 = inlined_call_operand.vmem [shape: f32[1,256], index: 6, kind: input, shape index: {}]   ;;  %s1857_s7 = inlined_call_operand.vmem [shape: f32[2,8,256], index: 7, kind: output, shape index: {}]  }
   0x1   :  { %s1412_s26 = smov 0  }
   0x2 LB: > { %s29_s27 = sadd.s32 1, %s1350_s25  ;;  %p1265_p0 = scmp.ge.s32.totalorder %s1354_s26, 1  ;;  %s1354_s26 = sphi %s1412_s26, %s17_s26   ;;  %s1350_s25 = sphi %s1410_s25, %s1859_s25   ;;  %s1346_s24 = sphi %s1408_s24, %s1858_s24  }
   0x3   : > { %p31_p1 = scmp.ge.s32.totalorder %s29_s27, 2  ;;  %p261_p2 = scmp.lt.s32.totalorder %s1354_s26, 3 }
   0x5   : > { %s1861_s27 = smov (%p31_p1, %s29_s27), 0  ;;  %p262_p3 = pnand %p1265_p0, %p261_p2 }
   0x6   : > { %v318_v0 = vlaneseq (!%p262_p3)  ;;  %p324_p4 = scmp.eq.s32.totalorder (!%p262_p3), %s1346_s24, 0  ;;  %v1356_v2 = vmov (!%p262_p3), 0.0   ;;  %p1266_p5 = scmp.ne.s32.totalorder (!%p262_p3), %s1346_s24, 0 }
   0x7   : > { %265 = sbr.rel (%p262_p3) target bundleno = 719 (0x2cf), region = 48 }
   0x8   : > { %v1430_v1 = vshrl.u32 (!%p262_p3), %v318_v0, 7 }
   0xa   : > { %vm320_vm0 = vcmp.ge.s32.totalorder (!%p262_p3), %v1430_v1, 1  ;;  %vm322_vm1 = vcmp.le.s32.totalorder (!%p262_p3), %v1430_v1, 6 }
   0xb   : > { %v1434_v3 = vsel (!%p262_p3), %vm320_vm0, 1.0, %v1356_v2  ;;  %v1436_v4 = vsel (!%p262_p3), %vm322_vm1, 1.0, %v1356_v2 }
   0xe   : > { %327 = sbr.rel (%p1266_p5) target bundleno = 228 (0xe4), region = 52  ;;  %v1442_v5 = vld [vmem:[%s1850_s0 + $0x10] sm:$0xff] (!%p1266_p5)  ;;  %v1447_v6 = vld [vmem:[%s1850_s0] sm:$0xff] (!%p1266_p5)  ;;  %v1452_v7 = vld [vmem:[%s1850_s0 + $0x18] sm:$0xff] (!%p1266_p5)  ;;  %s1357_s13 = smov (!%p1266_p5), 32   ;;  %v1359_v25 = vmov (!%p1266_p5), 0.0  }
   0xf   : > { %v553_v8 = vrot.slane (!%p1266_p5), %v1442_v5, 7  ;;  %v335_v9 = vrot.slane (!%p1266_p5), %v1447_v6, 7  ;;  %v554_v10 = vrot.slane (!%p1266_p5), %v1452_v7, 7  ;;  %v1460_v11 = vld [vmem:[%s1850_s0 + $0x8] sm:$0xff] (!%p1266_p5)  ;;  %s1358_s14 = smov (!%p1266_p5), 96   ;;  %v339_v18 = vrot.slane (!%p1266_p5), %v1447_v6, 1 }
  0x10   : > { %v336_v12 = vrot.slane (!%p1266_p5), %v1460_v11, 7  ;;  %v340_v17 = vrot.slane (!%p1266_p5), %v1460_v11, 1  ;;  %v558_v21 = vrot.slane (!%p1266_p5), %v1452_v7, 1  ;;  %v557_v22 = vrot.slane (!%p1266_p5), %v1442_v5, 1  ;;  %685 = vst [vmem:[#allocation3] sm:$0xf] (!%p1266_p5), %v1359_v25 }
  0x11   : > { %v1464_v13 = vmul.f32 (!%p1266_p5), %v553_v8, %v1434_v3  ;;  %v337_v14 = vmul.f32 (!%p1266_p5), %v335_v9, %v1434_v3  ;;  %v1471_v15 = vmul.f32 (!%p1266_p5), %v554_v10, %v1434_v3  ;;  %v1497_v20 = vmul.f32 (!%p1266_p5), %v339_v18, %v1436_v4  ;;  %v1528_v30 = vld [vmem:[%s1851_s1 + $0x8] sm:$0xff] (!%p1266_p5)  ;;  %v1533_v31 = vld [vmem:[%s1851_s1] sm:$0xff] (!%p1266_p5) }
  0x12   : > { %v338_v16 = vmul.f32 (!%p1266_p5), %v336_v12, %v1434_v3  ;;  %v1494_v19 = vmul.f32 (!%p1266_p5), %v340_v17, %v1436_v4  ;;  %v1506_v23 = vmul.f32 (!%p1266_p5), %v558_v21, %v1436_v4  ;;  %v1509_v24 = vmul.f32 (!%p1266_p5), %v557_v22, %v1436_v4 }
  0x13   : > { %561 = vrot.lane.b32.xlu1 (!%p1266_p5), %v1464_v13, %s1357_s13  ;;  %343 = vrot.lane.b32.xlu0 (!%p1266_p5), %v337_v14, %s1357_s13  ;;  %v1520_v28 = vand.u32 (!%p1266_p5), 127, %v318_v0  ;;  %v1523_v29 = vsub.s32 (!%p1266_p5), 1, %v1430_v1  ;;  %v1536_v32 = vsub.s32 (!%p1266_p5), 0, %v1430_v1  ;;  %v385_v37 = vsub.s32 (!%p1266_p5), 2, %v1430_v1 }
  0x14   : > { %v421_v38 = vsub.s32 (!%p1266_p5), 4, %v1430_v1  ;;  %v409_v45 = vsub.s32 (!%p1266_p5), 3, %v1430_v1  ;;  %vm708_vm4 = vcmp.lt.s32.totalorder (!%p1266_p5), %v318_v0, 256 }
  0x15   : > { %vm349_vm2 = vcmp.lt.s32.totalorder %v1520_v28, 32  ;;  %v374_v35 = vrot.slane %v1533_v31, %v1523_v29  ;;  %v378_v36 = vrot.slane %v1528_v30, %v1523_v29  ;;  %v362_v39 = vrot.slane %v1533_v31, %v1536_v32 }
  0x16   : > { %v366_v40 = vrot.slane %v1528_v30, %v1536_v32  ;;  %vm356_vm3 = vcmp.lt.s32.totalorder %v1520_v28, 96  ;;  %v386_v48 = vrot.slane %v1533_v31, %v385_v37  ;;  %v390_v49 = vrot.slane %v1528_v30, %v385_v37 }
  0x17   : > { %563 = vrot.lane.b32.xlu1 %v1471_v15, %s1357_s13  ;;  %345 = vrot.lane.b32.xlu0 %v338_v16, %s1357_s13  ;;  %v379_v46 = vmul.f32 %v374_v35, %v337_v14  ;;  %v380_v47 = vmul.f32 %v378_v36, %v338_v16  ;;  %v422_v52 = vrot.slane %v1533_v31, %v421_v38 }
  0x18   : > { %v426_v53 = vrot.slane %v1528_v30, %v421_v38  ;;  %v410_v60 = vrot.slane %v1533_v31, %v409_v45  ;;  %v414_v61 = vrot.slane %v1528_v30, %v409_v45  ;;  %v577_v12 = vmul.f32 %v1464_v13, %v374_v35 }
  0x19   : > { %v427_v22 = vmul.f32 %v422_v52, %v1447_v6 }
  0x1a   : > { %v428_v25 = vmul.f32 %v426_v53, %v1460_v11 }
  0x1b   : > { %354 = vrot.lane.b32.xlu1 %v338_v16, %s1358_s14  ;;  %352 = vrot.lane.b32.xlu0 %v337_v14, %s1358_s14  ;;  %v578_v14 = vmul.f32 %v1471_v15, %v378_v36 }
  0x1f   : > { %569 = vrot.lane.b32.xlu1 %v1471_v15, %s1358_s14  ;;  %567 = vrot.lane.b32.xlu0 %v1464_v13, %s1358_s14 }
  0x23   : > { %397 = vrot.lane.b32.xlu1 %v1460_v11, %s1357_s13  ;;  %395 = vrot.lane.b32.xlu0 %v1447_v6, %s1357_s13 }
  0x27   : > { %587 = vrot.lane.b32.xlu1 %v1452_v7, %s1357_s13  ;;  %585 = vrot.lane.b32.xlu0 %v1442_v5, %s1357_s13 }
  0x2b   : > { %403 = vrot.lane.b32.xlu1 %v1460_v11, %s1358_s14  ;;  %401 = vrot.lane.b32.xlu0 %v1447_v6, %s1358_s14 }
  0x2f   : > { %593 = vrot.lane.b32.xlu1 %v1452_v7, %s1358_s14  ;;  %591 = vrot.lane.b32.xlu0 %v1442_v5, %s1358_s14 }
  0x33   : > { %445 = vrot.lane.b32.xlu1 %v1494_v19, %s1357_s13  ;;  %443 = vrot.lane.b32.xlu0 %v1497_v20, %s1357_s13 }
  0x37   : > { %611 = vrot.lane.b32.xlu1 %v1506_v23, %s1357_s13  ;;  %609 = vrot.lane.b32.xlu0 %v1509_v24, %s1357_s13 }
  0x3b   : > { %451 = vrot.lane.b32.xlu1 %v1494_v19, %s1358_s14  ;;  %449 = vrot.lane.b32.xlu0 %v1497_v20, %s1358_s14 }
  0x3f   : > { %617 = vrot.lane.b32.xlu1 %v1506_v23, %s1358_s14  ;;  %615 = vrot.lane.b32.xlu0 %v1509_v24, %s1358_s14 }
  0x85   : > { %v562_v26 = vpop.permute.xlu1 %561  ;;  %v344_v27 = vpop.permute.xlu0 %343 }
  0x89   : > { %v564_v33 = vpop.permute.xlu1 %563  ;;  %v346_v34 = vpop.permute.xlu0 %345 }
  0x8a   : > { %v350_v43 = vsel %vm349_vm2, %v344_v27, %v346_v34  ;;  %v351_v44 = vsel %vm349_vm2, %v346_v34, %v344_v27  ;;  %v565_v54 = vsel %vm349_vm2, %v562_v26, %v564_v33  ;;  %v566_v55 = vsel %vm349_vm2, %v564_v33, %v562_v26 }
  0x8b   : > { %v367_v56 = vmul.f32 %v362_v39, %v351_v44  ;;  %v368_v57 = vmul.f32 %v366_v40, %v350_v43  ;;  %v573_v9 = vmul.f32 %v566_v55, %v362_v39  ;;  %v574_v10 = vmul.f32 %v565_v54, %v366_v40 }
  0x8c   : > { %v433_v39 = vsub.s32 5, %v1430_v1  ;;  %v602_v43 = vmul.f32 %v1452_v7, %v426_v53  ;;  %v469_v54 = vsub.s32 7, %v1430_v1  ;;  %v457_v7 = vsub.s32 6, %v1430_v1 }
  0x8d   : > { %v355_v41 = vpop.permute.xlu1 %354  ;;  %v353_v42 = vpop.permute.xlu0 %352  ;;  %v381_v16 = vadd.f32 %v379_v46, %v367_v56  ;;  %v382_v17 = vadd.f32 %v380_v47, %v368_v57  ;;  %v579_v36 = vadd.f32 %v577_v12, %v573_v9  ;;  %v580_v38 = vadd.f32 %v578_v14, %v574_v10 }
  0x8e   : > { %v357_v50 = vsel %vm356_vm3, %v353_v42, %v355_v41  ;;  %v358_v51 = vsel %vm356_vm3, %v355_v41, %v353_v42  ;;  %v601_v42 = vmul.f32 %v1442_v5, %v422_v52  ;;  %v434_v52 = vrot.slane %v1533_v31, %v433_v39 }
  0x8f   : > { %v391_v62 = vmul.f32 %v386_v48, %v357_v50  ;;  %v392_v63 = vmul.f32 %v390_v49, %v358_v51  ;;  %v438_v53 = vrot.slane %v1528_v30, %v433_v39  ;;  %v458_v9 = vrot.slane %v1533_v31, %v457_v7 }
  0x90   : > { %v462_v10 = vrot.slane %v1528_v30, %v457_v7 }
  0x91   : > { %v570_v58 = vpop.permute.xlu1 %569  ;;  %v568_v59 = vpop.permute.xlu0 %567  ;;  %v393_v37 = vadd.f32 %v391_v62, %v381_v16  ;;  %v394_v13 = vadd.f32 %v392_v63, %v382_v17  ;;  %v474_v62 = vrot.slane %v1528_v30, %v469_v54  ;;  %v470_v63 = vrot.slane %v1533_v31, %v469_v54 }
  0x92   : > { %v571_v2 = vsel %vm356_vm3, %v568_v59, %v570_v58  ;;  %v572_v8 = vsel %vm356_vm3, %v570_v58, %v568_v59 }
  0x93   : > { %v581_v26 = vmul.f32 %v571_v2, %v386_v48  ;;  %v582_v27 = vmul.f32 %v572_v8, %v390_v49 }
  0x95   : > { %v398_v18 = vpop.permute.xlu1 %397  ;;  %v396_v21 = vpop.permute.xlu0 %395  ;;  %v583_v44 = vadd.f32 %v581_v26, %v579_v36  ;;  %v584_v45 = vadd.f32 %v582_v27, %v580_v38 }
  0x96   : > { %v399_v33 = vsel %vm349_vm2, %v396_v21, %v398_v18  ;;  %v400_v34 = vsel %vm349_vm2, %v398_v18, %v396_v21  ;;  %v476_v18 = vmul.f32 %v474_v62, %v1494_v19  ;;  %v475_v21 = vmul.f32 %v470_v63, %v1497_v20 }
  0x97   : > { %v415_v35 = vmul.f32 %v410_v60, %v400_v34  ;;  %v416_v15 = vmul.f32 %v414_v61, %v399_v33  ;;  %v625_v19 = vmul.f32 %v1509_v24, %v470_v63 }
  0x99   : > { %v417_v40 = vadd.f32 %v415_v35, %v393_v37  ;;  %v418_v6 = vadd.f32 %v416_v15, %v394_v13  ;;  %v588_v41 = vpop.permute.xlu1 %587  ;;  %v586_v11 = vpop.permute.xlu0 %585  ;;  %v626_v35 = vmul.f32 %v1506_v23, %v474_v62  ;;  %v332_v23 = vld [vmem:[%s1852_s2] sm:$0x3] }
  0x9a   : > { %v589_v46 = vsel %vm349_vm2, %v586_v11, %v588_v41  ;;  %v590_v47 = vsel %vm349_vm2, %v588_v41, %v586_v11  ;;  %v495_v54 = vrot.slane %v332_v23, %v1536_v32 }
  0x9b   : > { %v597_v48 = vmul.f32 %v590_v47, %v410_v60  ;;  %v598_v49 = vmul.f32 %v589_v46, %v414_v61  ;;  %v429_v50 = vadd.f32 %v427_v22, %v417_v40  ;;  %v430_v51 = vadd.f32 %v428_v25, %v418_v6 }
  0x9d   : > { %v599_v55 = vadd.f32 %v597_v48, %v583_v44  ;;  %v600_v56 = vadd.f32 %v598_v49, %v584_v45  ;;  %v404_v57 = vpop.permute.xlu1 %403  ;;  %v402_v5 = vpop.permute.xlu0 %401  ;;  %v1267_v44 = vld [vmem:[%s1851_s1 + $0x10] ss:$0 sm:$0xff]  ;;  %v1268_v45 = vld [vmem:[%s1851_s1 + $0x18] ss:$0 sm:$0xff] }
  0x9e   : > { %v405_v60 = vsel %vm356_vm3, %v402_v5, %v404_v57  ;;  %v406_v61 = vsel %vm356_vm3, %v404_v57, %v402_v5 }
  0x9f   : > { %v603_v58 = vadd.f32 %v601_v42, %v599_v55  ;;  %v604_v59 = vadd.f32 %v602_v43, %v600_v56  ;;  %v439_v12 = vmul.f32 %v434_v52, %v405_v60  ;;  %v440_v14 = vmul.f32 %v438_v53, %v406_v61 }
  0xa0   : > { %v499_v55 = vrot.slane %v332_v23, %v1523_v29 }
  0xa1   : > { %v594_v2 = vpop.permute.xlu1 %593  ;;  %v592_v8 = vpop.permute.xlu0 %591  ;;  %v441_v33 = vadd.f32 %v439_v12, %v429_v50  ;;  %v442_v34 = vadd.f32 %v440_v14, %v430_v51 }
  0xa2   : > { %v595_v16 = vsel %vm356_vm3, %v592_v8, %v594_v2  ;;  %v596_v17 = vsel %vm356_vm3, %v594_v2, %v592_v8 }
  0xa3   : > { %v605_v26 = vmul.f32 %v595_v16, %v434_v52  ;;  %v606_v27 = vmul.f32 %v596_v17, %v438_v53 }
  0xa5   : > { %v446_v22 = vpop.permute.xlu1 %445  ;;  %v444_v25 = vpop.permute.xlu0 %443  ;;  %v607_v39 = vadd.f32 %v605_v26, %v603_v58  ;;  %v608_v40 = vadd.f32 %v606_v27, %v604_v59 }
  0xa6   : > { %v447_v31 = vsel %vm349_vm2, %v444_v25, %v446_v22  ;;  %v448_v30 = vsel %vm349_vm2, %v446_v22, %v444_v25 }
  0xa7   : > { %v463_v37 = vmul.f32 %v458_v9, %v448_v30  ;;  %v464_v13 = vmul.f32 %v462_v10, %v447_v31 }
  0xa9   : > { %v465_v15 = vadd.f32 %v463_v37, %v441_v33  ;;  %v466_v20 = vadd.f32 %v464_v13, %v442_v34  ;;  %v612_v36 = vpop.permute.xlu1 %611  ;;  %v610_v38 = vpop.permute.xlu0 %609 }
  0xaa   : > { %v613_v6 = vsel %vm349_vm2, %v610_v38, %v612_v36  ;;  %v614_v41 = vsel %vm349_vm2, %v612_v36, %v610_v38 }
  0xab   : > { %v621_v11 = vmul.f32 %v614_v41, %v458_v9  ;;  %v622_v42 = vmul.f32 %v613_v6, %v462_v10  ;;  %v477_v43 = vadd.f32 %v475_v21, %v465_v15  ;;  %v478_v24 = vadd.f32 %v476_v18, %v466_v20 }
  0xad   : > { %v623_v46 = vadd.f32 %v621_v11, %v607_v39  ;;  %v624_v47 = vadd.f32 %v622_v42, %v608_v40  ;;  %v452_v48 = vpop.permute.xlu1 %451  ;;  %v450_v49 = vpop.permute.xlu0 %449 }
  0xae   : > { %v453_v50 = vsel %vm356_vm3, %v450_v49, %v452_v48  ;;  %v454_v51 = vsel %vm356_vm3, %v452_v48, %v450_v49 }
  0xaf   : > { %v487_v56 = vmul.f32 %v1267_v44, %v453_v50  ;;  %v488_v57 = vmul.f32 %v1268_v45, %v454_v51  ;;  %v627_v5 = vadd.f32 %v625_v19, %v623_v46  ;;  %v628_v7 = vadd.f32 %v626_v35, %v624_v47 }
  0xb1   : > { %v489_v52 = vadd.f32 %v487_v56, %v477_v43  ;;  %v490_v53 = vadd.f32 %v488_v57, %v478_v24  ;;  %v618_v58 = vpop.permute.xlu1 %617  ;;  %v616_v59 = vpop.permute.xlu0 %615 }
  0xb2   : > { %v619_v60 = vsel %vm356_vm3, %v616_v59, %v618_v58  ;;  %v620_v61 = vsel %vm356_vm3, %v618_v58, %v616_v59  ;;  %v1360_v58 = vmov 1966171168  }
  0xb3   : > { %v502_v62 = vadd.f32 %v495_v54, %v489_v52  ;;  %v503_v63 = vadd.f32 %v499_v55, %v490_v53  ;;  %v629_v2 = vmul.f32 %v1267_v44, %v619_v60  ;;  %v630_v32 = vmul.f32 %v1268_v45, %v620_v61 }
  0xb4   : > { %v691_v59 = vunpack.c.l.s4 %v1360_v58 }
  0xb5   : > { %v506_v8 = vmul.f32 0.70710677, %v502_v62  ;;  %v507_v29 = vmul.f32 0.70710677, %v503_v63  ;;  %v631_v9 = vadd.f32 %v629_v2, %v627_v5  ;;  %v632_v10 = vadd.f32 %v630_v32, %v628_v7 }
  0xb6   : > { %v504_v28 = vmul.f32 0.5, %v502_v62  ;;  %v505_v25 = vmul.f32 0.5, %v503_v63 }
  0xb7   : > { %1322 = verf.f32 %v506_v8  ;;  %v633_v12 = vadd.f32 %v631_v9, %v495_v54  ;;  %v634_v14 = vadd.f32 %v632_v10, %v499_v55 }
  0xb8   : > { %1324 = verf.f32 %v507_v29 }
  0xb9   : > { %v637_v16 = vmul.f32 0.70710677, %v633_v12  ;;  %v638_v17 = vmul.f32 0.70710677, %v634_v14  ;;  %v635_v19 = vmul.f32 0.5, %v633_v12  ;;  %v636_v38 = vmul.f32 0.5, %v634_v14 }
  0xbb   : > { %1326 = verf.f32 %v637_v16  ;;  %v692_v16 = vunpack.c.0.s8 %v691_v59 }
  0xbc   : > { %1328 = verf.f32 %v638_v17 }
  0xc1   : > { %v1323_v18 = vpop.eup %1322 }
  0xc2   : > { %v1325_v21 = vpop.eup %1324  ;;  %v510_v22 = vadd.f32 1.0, %v1323_v18 }
  0xc3   : > { %v511_v26 = vadd.f32 1.0, %v1325_v21 }
  0xc4   : > { %v512_v27 = vmul.f32 %v510_v22, %v504_v28 }
  0xc5   : > { %v513_v31 = vmul.f32 %v511_v26, %v505_v25  ;;  %v1327_v30 = vpop.eup %1326 }
  0xc6   : > { %518 = vst [vmem:[#allocation2] sm:$0xff] %v512_v27  ;;  %v520_v33 = vrot.slane %v512_v27, 4  ;;  %v534_v34 = vmul.f32 %v512_v27, %v512_v27  ;;  %v1329_v37 = vpop.eup %1328  ;;  %v641_v15 = vadd.f32 1.0, %v1327_v30 }
  0xc7   : > { %519 = vst [vmem:[#allocation2 + $0x8] sm:$0xff] %v513_v31  ;;  %v526_v13 = vrot.slane %v513_v31, 4  ;;  %v535_v35 = vmul.f32 %v513_v31, %v513_v31  ;;  %v642_v39 = vadd.f32 1.0, %v1329_v37  ;;  %v695_v37 = vsub.s32 %v692_v16, %v1430_v1 }
  0xc8   : > { %v521_v20 = vadd.f32 %v520_v33, %v512_v27  ;;  %v536_v36 = vrot.slane %v534_v34, 4  ;;  %v643_v41 = vmul.f32 %v641_v15, %v635_v19 }
  0xc9   : > { %v527_v40 = vadd.f32 %v526_v13, %v513_v31  ;;  %v542_v6 = vrot.slane %v535_v35, 4  ;;  %v644_v23 = vmul.f32 %v642_v39, %v636_v38  ;;  %v686_v39 = vld [vmem:[#allocation3] ss:$2 sm:$0x3] }
  0xca   : > { %v522_v11 = vrot.slane %v521_v20, 2  ;;  %v537_v42 = vadd.f32 %v536_v36, %v534_v34  ;;  %1271 = vst [vmem:[#allocation2 + $0x10] sm:$0xff] %v643_v41  ;;  %v651_v44 = vrot.slane %v643_v41, 4  ;;  %v665_v45 = vmul.f32 %v643_v41, %v643_v41 }
  0xcb   : > { %v528_v43 = vrot.slane %v527_v40, 2  ;;  %v543_v24 = vadd.f32 %v542_v6, %v535_v35  ;;  %1272 = vst [vmem:[#allocation2 + $0x18] sm:$0xff] %v644_v23  ;;  %v657_v47 = vrot.slane %v644_v23, 4  ;;  %v666_v48 = vmul.f32 %v644_v23, %v644_v23 }
  0xcc   : > { %v538_v46 = vrot.slane %v537_v42, 2  ;;  %v523_v49 = vadd.f32 %v522_v11, %v521_v20  ;;  %v652_v51 = vadd.f32 %v651_v44, %v643_v41  ;;  %v667_v54 = vrot.slane %v665_v45, 4  ;;  %v712_v41 = vld [vmem:[#allocation3 + $0x1] ss:$2 sm:$0x3] }
  0xcd   : > { %v544_v50 = vrot.slane %v543_v24, 2  ;;  %v529_v55 = vadd.f32 %v528_v43, %v527_v40  ;;  %v658_v56 = vadd.f32 %v657_v47, %v644_v23  ;;  %v673_v57 = vrot.slane %v666_v48, 4 }
  0xce   : > { %v539_v5 = vadd.f32 %v538_v46, %v537_v42  ;;  %v653_v7 = vrot.slane %v652_v51, 2  ;;  %v668_v52 = vadd.f32 %v667_v54, %v665_v45  ;;  %v524_v62 = vrot.slane %v523_v49, 1 }
  0xcf   : > { %v545_v53 = vadd.f32 %v544_v50, %v543_v24  ;;  %v659_v60 = vrot.slane %v658_v56, 2  ;;  %v674_v61 = vadd.f32 %v673_v57, %v666_v48  ;;  %v530_v32 = vrot.slane %v529_v55, 1 }
  0xd0   : > { %v654_v63 = vadd.f32 %v653_v7, %v652_v51  ;;  %v669_v2 = vrot.slane %v668_v52, 2  ;;  %v540_v9 = vrot.slane %v539_v5, 1  ;;  %v525_v21 = vadd.f32 %v524_v62, %v523_v49 }
  0xd1   : > { %v660_v8 = vadd.f32 %v659_v60, %v658_v56  ;;  %v675_v29 = vrot.slane %v674_v61, 2  ;;  %v546_v14 = vrot.slane %v545_v53, 1  ;;  %v531_v25 = vadd.f32 %v530_v32, %v529_v55 }
  0xd2   : > { %v655_v10 = vrot.slane %v654_v63, 1  ;;  %v670_v12 = vadd.f32 %v669_v2, %v668_v52  ;;  %v541_v31 = vadd.f32 %v540_v9, %v539_v5 }
  0xd3   : > { %v661_v17 = vrot.slane %v660_v8, 1  ;;  %v676_v18 = vadd.f32 %v675_v29, %v674_v61  ;;  %v547_v34 = vadd.f32 %v546_v14, %v545_v53 }
  0xd4   : > { %v656_v28 = vadd.f32 %v655_v10, %v654_v63  ;;  %v671_v22 = vrot.slane %v670_v12, 1 }
  0xd5   : > { %v662_v26 = vadd.f32 %v661_v17, %v660_v8  ;;  %v677_v27 = vrot.slane %v676_v18, 1 }
  0xd6   : > { %v663_v30 = vadd.f32 %v656_v28, %v525_v21  ;;  %v672_v33 = vadd.f32 %v671_v22, %v670_v12 }
  0xd7   : > { %v664_v13 = vadd.f32 %v662_v26, %v531_v25  ;;  %v678_v35 = vadd.f32 %v677_v27, %v676_v18 }
  0xd8   : > { %v679_v19 = vadd.f32 %v672_v33, %v541_v31 }
  0xd9   : > { %v680_v15 = vadd.f32 %v678_v35, %v547_v34  ;;  %v689_v20 = vcombine.low %v663_v30, %v664_v13 }
  0xdb   : > { %v696_v36 = vrot.slane %v689_v20, %v695_v37  ;;  %v715_v38 = vcombine.low %v679_v19, %v680_v15 }
  0xdd   : > { %v703_v40 = vrot.slane %v696_v36, %v695_v37  ;;  %v722_v6 = vrot.slane %v715_v38, %v695_v37 }
  0xdf   : > { %v705_v11 = vadd.f32 %v703_v40, %v686_v39  ;;  %v729_v42 = vrot.slane %v722_v6, %v695_v37 }
  0xe1   : > { %710 = vst.msk [vmem:[#allocation3] ss:$2 sm:$0x3] %vm708_vm4, %v705_v11  ;;  %v731_v23 = vadd.f32 %v729_v42, %v712_v41 }
  0xe3   : > { %732 = vst.msk [vmem:[#allocation3 + $0x1] ss:$2 sm:$0x3] %vm708_vm4, %v731_v23 }
  0xe4 PF: > { %737 = sbr.rel (!%p324_p4) target bundleno = 537 (0x219), region = 60  ;;  %v1361_v43 = vmov (%p324_p4), 1983009808   ;;  %s1362_s29 = smov (%p324_p4), 32   ;;  %v755_v49 = vand.u32 (%p324_p4), 127, %v318_v0  ;;  %vm863_vm7 = vcmp.lt.s32.totalorder (%p324_p4), %v318_v0, 256 }
  0xe5   : > { %v741_v24 = vunpack.c.l.s4 (%p324_p4), %v1361_v43  ;;  %s1363_s30 = smov (%p324_p4), 64   ;;  %v1364_v18 = vmov (%p324_p4), 1966171168   ;;  %v1365_v22 = vmov (%p324_p4), 857870592  }
  0xe6   : > { %vm756_vm5 = vcmp.lt.s32.totalorder (%p324_p4), %v755_v49, 32  ;;  %vm786_vm6 = vcmp.lt.s32.totalorder (%p324_p4), %v755_v49, 64  ;;  %v831_v21 = vunpack.c.l.s4 (%p324_p4), %v1364_v18  ;;  %v843_v25 = vunpack.c.l.s4 (%p324_p4), %v1365_v22  ;;  %v826_v33 = vld [vmem:[%s1855_s5] sm:$0x3] (%p324_p4) }
  0xe7   : > { %v742_v44 = vunpack.c.0.s8 (%p324_p4), %v741_v24  ;;  %v840_v15 = vld [vmem:[%s1856_s6] sm:$0x3] (%p324_p4) }
  0xe8   : > { %v832_v28 = vunpack.c.0.s8 (%p324_p4), %v831_v21  ;;  %v844_v27 = vunpack.c.0.s8 (%p324_p4), %v843_v25 }
  0xe9   : > { %v745_v46 = vsub.s32 (%p324_p4), %v742_v44, %v1430_v1 }
  0xea   : > { %v738_v45 = vld [vmem:[#allocation3] sm:$0xf] (%p324_p4)  ;;  %v835_v26 = vsub.s32 (%p324_p4), %v832_v28, %v1430_v1  ;;  %v847_v34 = vsub.s32 (%p324_p4), %v844_v27, %v1430_v1 }
  0xeb   : > { %v746_v47 = vrot.slane %v738_v45, %v745_v46 }
  0xed   : > { %750 = vrot.lane.b32.xlu0 %v746_v47, %s1362_s29  ;;  %v747_v48 = vcombine.high %v746_v47, %v746_v47 }
  0xf1   : > { %752 = vrot.lane.b32.xlu0 %v747_v48, %s1362_s29 }
 0x15f   : > { %v751_v50 = vpop.permute.xlu0 %750 }
 0x163   : > { %v753_v51 = vpop.permute.xlu0 %752 }
 0x164   : > { %v757_v54 = vsel %vm756_vm5, %v751_v50, %v753_v51  ;;  %v758_v55 = vsel %vm756_vm5, %v753_v51, %v751_v50 }
 0x165   : > { %v761_v56 = vcombine.low %v758_v55, %v757_v54 }
 0x167   : > { %v768_v57 = vrot.slane %v761_v56, %v745_v46 }
 0x169   : > { %v770_v5 = vadd.f32 %v768_v57, %v738_v45 }
 0x16b   : > { %v778_v7 = vrot.slane %v770_v5, %v745_v46 }
 0x16d   : > { %782 = vrot.lane.b32.xlu1 %v778_v7, %s1363_s30  ;;  %v779_v52 = vcombine.high %v778_v7, %v778_v7 }
 0x171   : > { %784 = vrot.lane.b32.xlu1 %v779_v52, %s1363_s30 }
 0x1df   : > { %v783_v53 = vpop.permute.xlu1 %782 }
 0x1e3   : > { %v785_v58 = vpop.permute.xlu1 %784 }
 0x1e4   : > { %v787_v59 = vsel %vm786_vm6, %v783_v53, %v785_v58  ;;  %v788_v60 = vsel %vm786_vm6, %v785_v58, %v783_v53 }
 0x1e5   : > { %v791_v61 = vcombine.low %v788_v60, %v787_v59 }
 0x1e7   : > { %v798_v62 = vrot.slane %v791_v61, %v745_v46 }
 0x1e9   : > { %v800_v63 = vadd.f32 %v798_v62, %v770_v5 }
 0x1eb   : > { %v808_v2 = vrot.slane %v800_v63, %v745_v46 }
 0x1ed   : > { %v809_v32 = vcombine.high %v808_v2, %v808_v2 }
 0x1ef   : > { %v810_v8 = vcombine.low %v809_v32, %v808_v2 }
 0x1f1   : > { %v817_v29 = vrot.slane %v810_v8, %v745_v46 }
 0x1f3   : > { %v819_v9 = vadd.f32 %v817_v29, %v800_v63 }
 0x1f5   : > { %v820_v10 = vmul.f32 0.0078125, %v819_v9 }
 0x1f7   : > { %v821_v12 = vmul.f32 %v820_v10, %v820_v10 }
 0x1f9   : > { %v823_v14 = vrot.slane %v821_v12, 7 }
 0x1fb   : > { %v825_v16 = vsub.f32 %v820_v10, %v823_v14 }
 0x1fd   : > { %v827_v17 = vadd.f32 1e-05, %v825_v16 }
 0x1ff   : > { %1330 = vrsqrt.f32 %v827_v17 }
 0x209   : > { %v1331_v31 = vpop.eup %1330 }
 0x20a   : > { %v836_v30 = vrot.slane %v1331_v31, %v835_v26 }
 0x20c   : > { %v837_v37 = vcombine.high %v836_v30, %v836_v30 }
 0x20e   : > { %v839_v13 = vmul.f32 %v837_v37, %v826_v33 }
 0x210   : > { %v848_v35 = vrot.slane %v839_v13, %v847_v34  ;;  %865 = vst.msk [vmem:[#allocation3] ss:$2 sm:$0x3] %vm863_vm7, %v839_v13 }
 0x212   : > { %v850_v19 = vmul.f32 %v848_v35, %v820_v10 }
 0x214   : > { %v858_v20 = vrot.slane %v850_v19, %v835_v26 }
 0x216   : > { %v860_v36 = vsub.f32 %v840_v15, %v858_v20 }
 0x218   : > { %867 = vst.msk [vmem:[#allocation3 + $0x1] ss:$2 sm:$0x3] %vm863_vm7, %v860_v36 }
 0x219 PF: > { %p1274_p6 = scmp.ne.s32.totalorder %s1346_s24, 1 }
 0x21a   : > { %v877_v38 = vld [vmem:[#allocation3] ss:$2 sm:$0x3] (!%p1274_p6)  ;;  %v1652_v40 = vsub.s32 (!%p1274_p6), 0, %v1430_v1  ;;  %v1277_v6 = vld [vmem:[#allocation2 + $0x10] sm:$0xff] (!%p1274_p6)  ;;  %v1655_v41 = vsub.s32 (!%p1274_p6), 1, %v1430_v1 }
 0x21b   : > { %871 = sbr.rel (%p1274_p6) target bundleno = 719 (0x2cf), region = 64  ;;  %v884_v11 = vld [vmem:[#allocation2] sm:$0xff] (!%p1274_p6)  ;;  %v1278_v42 = vld [vmem:[#allocation2 + $0x18] sm:$0xff] (!%p1274_p6)  ;;  %v885_v23 = vld [vmem:[#allocation2 + $0x8] sm:$0xff] (!%p1274_p6)  ;;  %s1366_s15 = smov (!%p1274_p6), 32   ;;  %v1736_v21 = vand.u32 (!%p1274_p6), 127, %v318_v0 }
 0x21c   : > { %v890_v43 = vrot.slane (!%p1274_p6), %v877_v38, %v1652_v40  ;;  %v894_v44 = vrot.slane (!%p1274_p6), %v877_v38, %v1655_v41  ;;  %v1664_v50 = vld [vmem:[%s1853_s3 + $0x8] sm:$0xff] (!%p1274_p6)  ;;  %v1669_v51 = vld [vmem:[%s1853_s3] sm:$0xff] (!%p1274_p6)  ;;  %s1367_s16 = smov (!%p1274_p6), 96   ;;  %v962_v31 = vsub.s32 (!%p1274_p6), 2, %v1430_v1  ;;  %v998_v15 = vsub.s32 (!%p1274_p6), 4, %v1430_v1 }
 0x21d   : > { %v951_v5 = vrot.slane (!%p1274_p6), %v1669_v51, %v1655_v41  ;;  %v955_v7 = vrot.slane (!%p1274_p6), %v1664_v50, %v1655_v41  ;;  %vm926_vm8 = vcmp.lt.s32.totalorder (!%p1274_p6), %v1736_v21, 32  ;;  %v939_v22 = vrot.slane (!%p1274_p6), %v1669_v51, %v1652_v40 }
 0x21e   : > { %v1089_v46 = vmul.f32 (!%p1274_p6), %v1277_v6, %v890_v43  ;;  %v897_v47 = vmul.f32 (!%p1274_p6), %v890_v43, %v884_v11  ;;  %v1090_v48 = vmul.f32 (!%p1274_p6), %v1278_v42, %v894_v44  ;;  %v898_v49 = vmul.f32 (!%p1274_p6), %v894_v44, %v885_v23 }
 0x21f   : > { %v879_v39 = vld [vmem:[#allocation3 + $0x1] ss:$2 sm:$0x3] (!%p1274_p6)  ;;  %v943_v25 = vrot.slane (!%p1274_p6), %v1664_v50, %v1652_v40  ;;  %vm933_vm9 = vcmp.lt.s32.totalorder (!%p1274_p6), %v1736_v21, 96  ;;  %v986_v42 = vsub.s32 (!%p1274_p6), 3, %v1430_v1  ;;  %v963_v23 = vrot.slane (!%p1274_p6), %v1669_v51, %v962_v31 }
 0x220   : > { %v903_v24 = vrot.slane (!%p1274_p6), %v879_v39, %v1652_v40  ;;  %v907_v45 = vrot.slane (!%p1274_p6), %v879_v39, %v1655_v41  ;;  %v967_v43 = vrot.slane (!%p1274_p6), %v1664_v50, %v962_v31 }
 0x222   : > { %v1671_v54 = vadd.f32 %v1089_v46, %v903_v24  ;;  %v1673_v55 = vadd.f32 %v903_v24, %v897_v47  ;;  %v1675_v56 = vadd.f32 %v1090_v48, %v907_v45  ;;  %v1677_v57 = vadd.f32 %v907_v45, %v898_v49 }
 0x223   : > { %v999_v47 = vrot.slane %v1669_v51, %v998_v15  ;;  %v1003_v48 = vrot.slane %v1664_v50, %v998_v15  ;;  %v987_v49 = vrot.slane %v1669_v51, %v986_v42 }
 0x224   : > { %v1093_v52 = vrot.slane %v1671_v54, 7  ;;  %v912_v53 = vrot.slane %v1673_v55, 7  ;;  %v1094_v58 = vrot.slane %v1675_v56, 7  ;;  %v913_v59 = vrot.slane %v1677_v57, 7 }
 0x225   : > { %v916_v9 = vrot.slane %v1673_v55, 1  ;;  %v1098_v14 = vrot.slane %v1675_v56, 1  ;;  %v1097_v16 = vrot.slane %v1671_v54, 1 }
 0x226   : > { %v1095_v60 = vmul.f32 %v1093_v52, %v1434_v3  ;;  %v914_v61 = vmul.f32 %v912_v53, %v1434_v3  ;;  %v1096_v62 = vmul.f32 %v1094_v58, %v1434_v3  ;;  %v915_v63 = vmul.f32 %v913_v59, %v1434_v3 }
 0x227   : > { %v917_v3 = vrot.slane %v1677_v57, 1  ;;  %v1713_v12 = vmul.f32 %v916_v9, %v1436_v4  ;;  %v1722_v17 = vmul.f32 %v1098_v14, %v1436_v4  ;;  %v1725_v18 = vmul.f32 %v1097_v16, %v1436_v4 }
 0x228   : > { %1101 = vrot.lane.b32.xlu1 %v1095_v60, %s1366_s15  ;;  %920 = vrot.lane.b32.xlu0 %v914_v61, %s1366_s15  ;;  %v1117_v2 = vmul.f32 %v1095_v60, %v951_v5  ;;  %v1118_v32 = vmul.f32 %v1096_v62, %v955_v7  ;;  %v956_v8 = vmul.f32 %v951_v5, %v914_v61  ;;  %v1010_v16 = vsub.s32 5, %v1430_v1 }
 0x229   : > { %v957_v29 = vmul.f32 %v955_v7, %v915_v63  ;;  %v1710_v10 = vmul.f32 %v917_v3, %v1436_v4  ;;  %v991_v5 = vrot.slane %v1664_v50, %v986_v42 }
 0x22c   : > { %1103 = vrot.lane.b32.xlu1 %v1096_v62, %s1366_s15  ;;  %922 = vrot.lane.b32.xlu0 %v915_v63, %s1366_s15 }
 0x230   : > { %931 = vrot.lane.b32.xlu1 %v915_v63, %s1367_s16  ;;  %929 = vrot.lane.b32.xlu0 %v914_v61, %s1367_s16  ;;  %v1004_v61 = vmul.f32 %v999_v47, %v1673_v55 }
 0x234   : > { %1109 = vrot.lane.b32.xlu1 %v1096_v62, %s1367_s16  ;;  %1107 = vrot.lane.b32.xlu0 %v1095_v60, %s1367_s16  ;;  %v1005_v62 = vmul.f32 %v1003_v48, %v1677_v57 }
 0x238   : > { %974 = vrot.lane.b32.xlu1 %v1677_v57, %s1366_s15  ;;  %972 = vrot.lane.b32.xlu0 %v1673_v55, %s1366_s15 }
 0x23c   : > { %1127 = vrot.lane.b32.xlu1 %v1675_v56, %s1366_s15  ;;  %1125 = vrot.lane.b32.xlu0 %v1671_v54, %s1366_s15 }
 0x240   : > { %980 = vrot.lane.b32.xlu1 %v1677_v57, %s1367_s16  ;;  %978 = vrot.lane.b32.xlu0 %v1673_v55, %s1367_s16  ;;  %v1141_v57 = vmul.f32 %v1671_v54, %v999_v47 }
 0x244   : > { %1133 = vrot.lane.b32.xlu1 %v1675_v56, %s1367_s16  ;;  %1131 = vrot.lane.b32.xlu0 %v1671_v54, %s1367_s16 }
 0x248   : > { %1022 = vrot.lane.b32.xlu1 %v1710_v10, %s1366_s15  ;;  %1020 = vrot.lane.b32.xlu0 %v1713_v12, %s1366_s15 }
 0x24c   : > { %1151 = vrot.lane.b32.xlu1 %v1722_v17, %s1366_s15  ;;  %1149 = vrot.lane.b32.xlu0 %v1725_v18, %s1366_s15 }
 0x250   : > { %1028 = vrot.lane.b32.xlu1 %v1710_v10, %s1367_s16  ;;  %1026 = vrot.lane.b32.xlu0 %v1713_v12, %s1367_s16 }
 0x254   : > { %1157 = vrot.lane.b32.xlu1 %v1722_v17, %s1367_s16  ;;  %1155 = vrot.lane.b32.xlu0 %v1725_v18, %s1367_s16 }
 0x29a   : > { %v1102_v28 = vpop.permute.xlu1 %1101  ;;  %v921_v4 = vpop.permute.xlu0 %920 }
 0x29e   : > { %v1104_v26 = vpop.permute.xlu1 %1103  ;;  %v923_v27 = vpop.permute.xlu0 %922 }
 0x29f   : > { %v1105_v30 = vsel %vm926_vm8, %v1102_v28, %v1104_v26  ;;  %v1106_v0 = vsel %vm926_vm8, %v1104_v26, %v1102_v28  ;;  %v927_v33 = vsel %vm926_vm8, %v921_v4, %v923_v27  ;;  %v928_v34 = vsel %vm926_vm8, %v923_v27, %v921_v4 }
 0x2a0   : > { %v1113_v37 = vmul.f32 %v1106_v0, %v939_v22  ;;  %v1114_v13 = vmul.f32 %v1105_v30, %v943_v25  ;;  %v944_v35 = vmul.f32 %v939_v22, %v928_v34  ;;  %v945_v19 = vmul.f32 %v943_v25, %v927_v33 }
 0x2a1   : > { %v1142_v25 = vmul.f32 %v1675_v56, %v1003_v48  ;;  %v1034_v56 = vsub.s32 6, %v1430_v1 }
 0x2a2   : > { %v1119_v20 = vadd.f32 %v1117_v2, %v1113_v37  ;;  %v1120_v36 = vadd.f32 %v1118_v32, %v1114_v13  ;;  %v958_v38 = vadd.f32 %v956_v8, %v944_v35  ;;  %v959_v39 = vadd.f32 %v957_v29, %v945_v19  ;;  %v932_v6 = vpop.permute.xlu1 %931  ;;  %v930_v11 = vpop.permute.xlu0 %929 }
 0x2a3   : > { %v934_v24 = vsel %vm933_vm9, %v930_v11, %v932_v6  ;;  %v935_v44 = vsel %vm933_vm9, %v932_v6, %v930_v11  ;;  %v1046_v13 = vsub.s32 7, %v1430_v1  ;;  %v1035_v1 = vrot.slane %v1669_v51, %v1034_v56 }
 0x2a4   : > { %v968_v7 = vmul.f32 %v963_v23, %v934_v24  ;;  %v969_v52 = vmul.f32 %v967_v43, %v935_v44  ;;  %v1039_v44 = vrot.slane %v1664_v50, %v1034_v56 }
 0x2a5   : > { %v1051_v42 = vrot.slane %v1664_v50, %v1046_v13 }
 0x2a6   : > { %v1110_v45 = vpop.permute.xlu1 %1109  ;;  %v1108_v46 = vpop.permute.xlu0 %1107  ;;  %v970_v29 = vadd.f32 %v968_v7, %v958_v38  ;;  %v971_v3 = vadd.f32 %v969_v52, %v959_v39 }
 0x2a7   : > { %v1111_v53 = vsel %vm933_vm9, %v1108_v46, %v1110_v45  ;;  %v1112_v58 = vsel %vm933_vm9, %v1110_v45, %v1108_v46 }
 0x2a8   : > { %v1121_v63 = vmul.f32 %v1111_v53, %v963_v23  ;;  %v1122_v2 = vmul.f32 %v1112_v58, %v967_v43  ;;  %v1047_v23 = vrot.slane %v1669_v51, %v1046_v13 }
 0x2aa   : > { %v975_v59 = vpop.permute.xlu1 %974  ;;  %v973_v60 = vpop.permute.xlu0 %972  ;;  %v1123_v26 = vadd.f32 %v1121_v63, %v1119_v20  ;;  %v1124_v27 = vadd.f32 %v1122_v2, %v1120_v36  ;;  %v1011_v20 = vrot.slane %v1669_v51, %v1010_v16  ;;  %v1015_v36 = vrot.slane %v1664_v50, %v1010_v16 }
 0x2ab   : > { %v976_v32 = vsel %vm926_vm8, %v973_v60, %v975_v59  ;;  %v977_v8 = vsel %vm926_vm8, %v975_v59, %v973_v60  ;;  %v1166_v63 = vmul.f32 %v1722_v17, %v1051_v42  ;;  %v876_v17 = vld [vmem:[%s1854_s4] sm:$0x3] }
 0x2ac   : > { %v992_v9 = vmul.f32 %v987_v49, %v977_v8  ;;  %v993_v14 = vmul.f32 %v991_v5, %v976_v32 }
 0x2ae   : > { %v994_v28 = vadd.f32 %v992_v9, %v970_v29  ;;  %v995_v4 = vadd.f32 %v993_v14, %v971_v3  ;;  %v1128_v22 = vpop.permute.xlu1 %1127  ;;  %v1126_v55 = vpop.permute.xlu0 %1125 }
 0x2af   : > { %v1129_v31 = vsel %vm926_vm8, %v1126_v55, %v1128_v22  ;;  %v1130_v30 = vsel %vm926_vm8, %v1128_v22, %v1126_v55  ;;  %v1275_v22 = vld [vmem:[%s1853_s3 + $0x10] ss:$0 sm:$0xff]  ;;  %v1276_v55 = vld [vmem:[%s1853_s3 + $0x18] ss:$0 sm:$0xff] }
 0x2b0   : > { %v1137_v0 = vmul.f32 %v1130_v30, %v987_v49  ;;  %v1138_v33 = vmul.f32 %v1129_v31, %v991_v5  ;;  %v1006_v34 = vadd.f32 %v1004_v61, %v994_v28  ;;  %v1007_v37 = vadd.f32 %v1005_v62, %v995_v4 }
 0x2b1   : > { %v1053_v49 = vmul.f32 %v1051_v42, %v1710_v10  ;;  %v1052_v5 = vmul.f32 %v1047_v23, %v1713_v12  ;;  %v1165_v10 = vmul.f32 %v1725_v18, %v1047_v23 }
 0x2b2   : > { %v1139_v35 = vadd.f32 %v1137_v0, %v1123_v26  ;;  %v1140_v19 = vadd.f32 %v1138_v33, %v1124_v27  ;;  %v981_v15 = vpop.permute.xlu1 %980  ;;  %v979_v54 = vpop.permute.xlu0 %978  ;;  %v1072_v0 = vrot.slane %v876_v17, %v1652_v40  ;;  %v1076_v33 = vrot.slane %v876_v17, %v1655_v41 }
 0x2b3   : > { %v982_v6 = vsel %vm933_vm9, %v979_v54, %v981_v15  ;;  %v983_v11 = vsel %vm933_vm9, %v981_v15, %v979_v54 }
 0x2b4   : > { %v1143_v38 = vadd.f32 %v1141_v57, %v1139_v35  ;;  %v1144_v39 = vadd.f32 %v1142_v25, %v1140_v19  ;;  %v1016_v45 = vmul.f32 %v1011_v20, %v982_v6  ;;  %v1017_v46 = vmul.f32 %v1015_v36, %v983_v11 }
 0x2b6   : > { %v1134_v43 = vpop.permute.xlu1 %1133  ;;  %v1132_v24 = vpop.permute.xlu0 %1131  ;;  %v1018_v59 = vadd.f32 %v1016_v45, %v1006_v34  ;;  %v1019_v60 = vadd.f32 %v1017_v46, %v1007_v37 }
 0x2b7   : > { %v1135_v47 = vsel %vm933_vm9, %v1132_v24, %v1134_v43  ;;  %v1136_v48 = vsel %vm933_vm9, %v1134_v43, %v1132_v24 }
 0x2b8   : > { %v1145_v53 = vmul.f32 %v1135_v47, %v1011_v20  ;;  %v1146_v58 = vmul.f32 %v1136_v48, %v1015_v36 }
 0x2ba   : > { %v1023_v7 = vpop.permute.xlu1 %1022  ;;  %v1021_v52 = vpop.permute.xlu0 %1020  ;;  %v1147_v29 = vadd.f32 %v1145_v53, %v1143_v38  ;;  %v1148_v3 = vadd.f32 %v1146_v58, %v1144_v39 }
 0x2bb   : > { %v1024_v51 = vsel %vm926_vm8, %v1021_v52, %v1023_v7  ;;  %v1025_v50 = vsel %vm926_vm8, %v1023_v7, %v1021_v52 }
 0x2bc   : > { %v1040_v61 = vmul.f32 %v1035_v1, %v1025_v50  ;;  %v1041_v62 = vmul.f32 %v1039_v44, %v1024_v51 }
 0x2be   : > { %v1042_v2 = vadd.f32 %v1040_v61, %v1018_v59  ;;  %v1043_v12 = vadd.f32 %v1041_v62, %v1019_v60  ;;  %v1152_v32 = vpop.permute.xlu1 %1151  ;;  %v1150_v8 = vpop.permute.xlu0 %1149 }
 0x2bf   : > { %v1153_v9 = vsel %vm926_vm8, %v1150_v8, %v1152_v32  ;;  %v1154_v14 = vsel %vm926_vm8, %v1152_v32, %v1150_v8 }
 0x2c0   : > { %v1161_v16 = vmul.f32 %v1154_v14, %v1035_v1  ;;  %v1162_v28 = vmul.f32 %v1153_v9, %v1039_v44  ;;  %v1054_v4 = vadd.f32 %v1052_v5, %v1042_v2  ;;  %v1055_v18 = vadd.f32 %v1053_v49, %v1043_v12 }
 0x2c2   : > { %v1163_v57 = vadd.f32 %v1161_v16, %v1147_v29  ;;  %v1164_v25 = vadd.f32 %v1162_v28, %v1148_v3  ;;  %v1029_v26 = vpop.permute.xlu1 %1028  ;;  %v1027_v27 = vpop.permute.xlu0 %1026 }
 0x2c3   : > { %v1030_v31 = vsel %vm933_vm9, %v1027_v27, %v1029_v26  ;;  %v1031_v30 = vsel %vm933_vm9, %v1029_v26, %v1027_v27 }
 0x2c4   : > { %v1064_v34 = vmul.f32 %v1275_v22, %v1030_v31  ;;  %v1065_v37 = vmul.f32 %v1276_v55, %v1031_v30  ;;  %v1167_v13 = vadd.f32 %v1165_v10, %v1163_v57  ;;  %v1168_v35 = vadd.f32 %v1166_v63, %v1164_v25 }
 0x2c6   : > { %v1066_v19 = vadd.f32 %v1064_v34, %v1054_v4  ;;  %v1067_v15 = vadd.f32 %v1065_v37, %v1055_v18  ;;  %v1158_v54 = vpop.permute.xlu1 %1157  ;;  %v1156_v56 = vpop.permute.xlu0 %1155 }
 0x2c7   : > { %v1159_v20 = vsel %vm933_vm9, %v1156_v56, %v1158_v54  ;;  %v1160_v36 = vsel %vm933_vm9, %v1158_v54, %v1156_v56 }
 0x2c8   : > { %v1079_v38 = vadd.f32 %v1072_v0, %v1066_v19  ;;  %v1080_v39 = vadd.f32 %v1076_v33, %v1067_v15  ;;  %v1169_v6 = vmul.f32 %v1275_v22, %v1159_v20  ;;  %v1170_v40 = vmul.f32 %v1276_v55, %v1160_v36 }
 0x2ca   : > { %1081 = vst [vmem:[%s1857_s7] sm:$0xff] %v1079_v38  ;;  %1082 = vst [vmem:[%s1857_s7 + $0x8] sm:$0xff] %v1080_v39  ;;  %v1171_v41 = vadd.f32 %v1169_v6, %v1167_v13  ;;  %v1172_v11 = vadd.f32 %v1170_v40, %v1168_v35 }
 0x2cc   : > { %v1173_v42 = vadd.f32 %v1171_v41, %v1072_v0  ;;  %v1174_v23 = vadd.f32 %v1172_v11, %v1076_v33 }
 0x2ce   : > { %1279 = vst [vmem:[%s1857_s7 + $0x10] sm:$0xff] %v1173_v42  ;;  %1280 = vst [vmem:[%s1857_s7 + $0x18] sm:$0xff] %v1174_v23 }
 0x2cf PF: > { %s17_s26 = sadd.s32 1, %s1354_s26   ;;  %s1858_s24 = smov %s1350_s25 }
 0x2d0   : > { %p14_p7 = scmp.ge.s32.totalorder %s17_s26, 4   ;;  %s1859_s25 = smov %s1861_s27 }
 0x2d2   :  { %16 = sbr.rel (!%p14_p7) target bundleno = 2 (0x2), region = 103 }

</bundles_post_ra>
